<compile_context>
chip_gen: v7x
topology: tpu7x:2x2x1
jax: 0.10.0
libtpu: 0.0.40
codegen_flags: <defaults>
</compile_context>

<pallas_src>
import functools

import jax
import jax.numpy as jnp
from jax.experimental import pallas as pl
from jax.experimental.pallas import tpu as pltpu


def _round_up(x, m):
    return (x + m - 1) // m * m


def _default_vmem_limit_bytes():
    # Generation-aware VMEM request: leave ~15% headroom for compiler scratch /
    # semaphores / pipeline bookkeeping (critical on v7x, 64 MiB physical per TC);
    # on v5e/v6e (128 MiB) this lands around ~100 MiB.
    try:
        cap = pltpu.get_tpu_info().vmem_capacity_bytes
    except Exception:
        cap = 64 * 1024 * 1024
    return min(int(cap * 0.85), 104 * 1024 * 1024)


# -----------------------------------------------------------------------------------
# Kernel: one (batch b, sequence-tile s) grid step.
#   y      = x @ [Vh_eff | gate^T]                      (single LHS push, f32 accum)
#   res    = y[:, :dS_pad]          logits = y[:, dS_pad:]     (lane-aligned slices)
#   rw     = relu(logits @ gate_up^T + bias_b)          (bias = task_proj + svd_S, f32)
#   out    = (res * rw) @ svd_U
# Padded seq rows have res == 0 and padded dS lanes have rw == 0, so the zero padding
# never leaks into the sliced-off outputs (would only break if a bias term were ever
# added on the res path).
# -----------------------------------------------------------------------------------
def moore_kernel(x_ref, w1_ref, gateup_ref, bias_ref, svdU_ref,
                 out_ref, logits_ref, *, dS_pad):
    x = x_ref[...]                                                       # (tile_s, IN)
    y = jnp.dot(x, w1_ref[...], preferred_element_type=jnp.float32)     # (tile_s, dS_pad+E_pad)
    res = y[:, :dS_pad]                                                  # f32
    logits = y[:, dS_pad:]                                               # f32

    rw = jnp.dot(logits.astype(gateup_ref.dtype), gateup_ref[...],
                 preferred_element_type=jnp.float32)                     # (tile_s, dS_pad)
    rw = jnp.maximum(rw + bias_ref[...], 0.0)                            # f32 bias (1, dS_pad) bcast
    res = res * rw                                                       # stays f32

    out_ref[...] = jnp.dot(res.astype(svdU_ref.dtype), svdU_ref[...],
                           preferred_element_type=jnp.float32).astype(out_ref.dtype)
    logits_ref[...] = logits.astype(logits_ref.dtype)


def prepare_moore_weights(params, *, r, compute_dtype=jnp.bfloat16, lane_align=128):
    """Grid-invariant weight prep, done ONCE per adapter (hoisted out of forward):
      * fold the r sequential Householder reflections into svd_Vh (in f32),
      * fuse [Vh_eff | gate^T] into one LHS weight (one x-LHS MXU matmul in the kernel),
      * zero-pad small dims up to lane-dense multiples of `lane_align`
        (128 default; use 256 on v6e/v7x to fill the 2x256 MXU),
      * cast resident weights to `compute_dtype` (bf16 default — MXU-native everywhere
        and halves resident VMEM; pass jnp.float32 for strict parity with an f32 module).
    """
    IN, dim_S = params["svd_Vh"].shape
    OUT = params["svd_U"].shape[1]
    E = params["gate_w"].shape[0]
    dS_pad = _round_up(dim_S, lane_align)
    E_pad = _round_up(E, lane_align)
    OUT_pad = _round_up(OUT, lane_align)

    # Fold Householder reflections (input-independent) into Vh, all in f32:
    #   x @ H_0 @ ... @ H_{r-1} @ Vh   with   H_i = I - 2 u_i u_i^T.
    u = params["hra_u"].astype(jnp.float32)
    u = u / jnp.linalg.norm(u, axis=1, keepdims=True)
    vh_eff = params["svd_Vh"].astype(jnp.float32)
    for i in reversed(range(r)):
        ui = u[i]
        vh_eff = vh_eff - 2.0 * ui[:, None] * (ui @ vh_eff)[None, :]

    # Fused LHS weight W1 = [Vh_eff | gate^T], lane-padded so the in-kernel split is free.
    w1 = jnp.zeros((IN, dS_pad + E_pad), jnp.float32)
    w1 = w1.at[:, :dim_S].set(vh_eff)
    w1 = w1.at[:, dS_pad:dS_pad + E].set(params["gate_w"].astype(jnp.float32).T)

    gateup = jnp.zeros((E_pad, dS_pad), jnp.float32).at[:E, :dim_S].set(
        params["gate_up_w"].astype(jnp.float32).T)
    svdU = jnp.zeros((dS_pad, OUT_pad), jnp.float32).at[:dim_S, :OUT].set(
        params["svd_U"].astype(jnp.float32))
    svdS = jnp.zeros((dS_pad,), jnp.float32).at[:dim_S].set(
        params["svd_S"].astype(jnp.float32))

    # TODO(synk): at production IN/dim_S ~ 4096 on v7x (64 MiB VMEM/TC) the resident
    # weights need a K-tiled reduction grid axis (f32 VMEM accumulator + pl.when
    # init/finalize) instead of staying fully resident; not needed at these sizes.
    return dict(
        w1=w1.astype(compute_dtype),
        gateup=gateup.astype(compute_dtype),
        svdU=svdU.astype(compute_dtype),
        svdS=svdS,                                                    # f32
        task_embedding=params["task_embedding"].astype(jnp.float32),
        task_linear_w=params["task_linear_w"].astype(jnp.float32),
        dims=dict(IN=IN, dim_S=dim_S, OUT=OUT, E=E,
                  dS_pad=dS_pad, E_pad=E_pad, OUT_pad=OUT_pad),
        compute_dtype=compute_dtype,
    )


def moore_forward(x, task_ids, prepared, *, tile_s=256, vmem_limit_bytes=None):
    """x: (B, S, in_features); task_ids: (B,) int32.
    Returns (result (B, S, out_features), router_logits (B*S, num_experts))."""
    B, S, IN = x.shape
    d = prepared["dims"]
    assert IN == d["IN"]
    cdt = prepared["compute_dtype"]
    out_dtype = x.dtype
    dS_pad, E_pad, OUT_pad = d["dS_pad"], d["E_pad"], d["OUT_pad"]

    if vmem_limit_bytes is None:
        vmem_limit_bytes = _default_vmem_limit_bytes()

    # Per-batch bias = task projection + svd_S (f32, lane-padded).  Fed to the kernel
    # as one (1, dS_pad) row per batch via the index_map — the (N, dim_S) per-token
    # broadcast is never materialized or streamed.
    temb = prepared["task_embedding"][task_ids]                       # (B, TE) gather
    tproj = temb @ prepared["task_linear_w"].T                        # (B, dim_S) f32
    bias = jnp.zeros((B, dS_pad), jnp.float32).at[:, :d["dim_S"]].set(tproj)
    bias = (bias + prepared["svdS"][None, :]).reshape(B, 1, dS_pad)

    # Sequence tiling: clamp tile_s to the (8-aligned) sequence length and only pad the
    # ragged tail (no full zeros+scatter copy of x).  Keep the (B, S_pad//tile_s) grid at
    # >= 2 steps so both v7x TensorCores get work.
    tile_s = _round_up(max(8, min(tile_s, _round_up(S, 8))), 8)
    S_pad = _round_up(S, tile_s)
    xs = x.astype(cdt)
    if S_pad != S:
        xs = jnp.pad(xs, ((0, 0), (0, S_pad - S), (0, 0)))

    grid = (B, S_pad // tile_s)
    kern = functools.partial(moore_kernel, dS_pad=dS_pad)

    def call(single_buffer_weights):
        # Grid-invariant weights: single-buffer them — their block index never changes,
        # so double buffering would only double resident VMEM.
        wkw = dict(pipeline_mode=pl.Buffered(1)) if single_buffer_weights else {}
        inv = lambda shape: pl.BlockSpec(shape, lambda b, s: (0, 0), **wkw)
        return pl.pallas_call(
            kern,
            grid=grid,
            in_specs=[
                pl.BlockSpec((None, tile_s, IN), lambda b, s: (b, s, 0)),   # x (token tiled)
                inv((IN, dS_pad + E_pad)),                                  # [Vh_eff | gate^T]
                inv((E_pad, dS_pad)),                                       # gate_up^T
                pl.BlockSpec((None, 1, dS_pad), lambda b, s: (b, 0, 0)),    # per-batch bias (f32)
                inv((dS_pad, OUT_pad)),                                     # svd_U
            ],
            out_specs=[
                pl.BlockSpec((None, tile_s, OUT_pad), lambda b, s: (b, s, 0)),
                pl.BlockSpec((None, tile_s, E_pad), lambda b, s: (b, s, 0)),
            ],
            out_shape=[
                jax.ShapeDtypeStruct((B, S_pad, OUT_pad), out_dtype),
                jax.ShapeDtypeStruct((B, S_pad, E_pad), cdt),  # bf16 logits writeback in prod
            ],
            compiler_params=pltpu.CompilerParams(
                dimension_semantics=("parallel", "parallel"),
                vmem_limit_bytes=vmem_limit_bytes),
        )(xs, prepared["w1"], prepared["gateup"], bias, prepared["svdU"])

    try:
        out_p, logits_p = call(True)
    except Exception:  # fallback if this JAX build rejects Buffered(1) on invariant specs
        out_p, logits_p = call(False)

    out = out_p[:, :S, :d["OUT"]]
    logits = logits_p[:, :S, :d["E"]].reshape(B * S, d["E"])
    return out, logits


def moore_ref(x, task_ids, params, r):
    """Pure-JAX reference mirroring the PyTorch forward (per-reflection f32 path)."""
    res = x.astype(jnp.float32)
    for i in range(r):
        ui = params["hra_u"][i][:, None].astype(jnp.float32)
        ui = ui / jnp.linalg.norm(ui)
        res = res - 2.0 * (res @ ui) @ ui.T
    res = res.astype(x.dtype)
    res = res @ params["svd_Vh"]
    temb = params["task_embedding"][task_ids] @ params["task_linear_w"].T   # (B, dim_S)
    logits = x @ params["gate_w"].T
    rw = logits @ params["gate_up_w"].T
    rw = temb[:, None, :] + rw + params["svd_S"]
    rw = jax.nn.relu(rw)
    res = res * rw
    res = res @ params["svd_U"]
    return res, logits.reshape(-1, logits.shape[-1])


if __name__ == "__main__":
    key = jax.random.PRNGKey(0)
    B, S = 2, 8
    IN, OUT = 32, 32                 # in_features_, out_features_
    dim_S = min(IN, OUT)
    r = 4                            # lora_r_
    E = 8                            # num_experts_
    TE = 16                          # task_embedding_dim_
    TASKS = 4                        # len(TASK_IDS)
    dtype = jnp.float32              # base layer weight dtype

    ks = jax.random.split(key, 8)

    # Base layer weight -> SVD (done once outside the kernel, as in __init__).
    base_w = jax.random.normal(ks[0], (OUT, IN), jnp.float32) * 0.05
    U, Ssv, Vh = jnp.linalg.svd(base_w, full_matrices=False)

    # hra_u_in init: kaiming-style random half, repeat_interleave(2) along the r dim.
    half_u = jax.random.uniform(ks[5], (r // 2, IN), jnp.float32, -0.3, 0.3)
    hra_u = jnp.repeat(half_u, 2, axis=0)                      # (r, IN)

    params = dict(
        svd_U=U.T[:dim_S, :].astype(dtype),                    # (dim_S, OUT)
        svd_S=Ssv[:dim_S].astype(dtype),                       # (dim_S,)
        svd_Vh=Vh.T[:, :dim_S].astype(dtype),                  # (IN, dim_S)
        gate_w=jax.random.uniform(ks[1], (E, IN), dtype, -0.1, 0.1),
        gate_up_w=jax.random.uniform(ks[2], (dim_S, E), dtype, -0.1, 0.1),
        task_embedding=jax.random.normal(ks[3], (TASKS, TE), dtype),
        task_linear_w=jax.random.uniform(ks[4], (dim_S, TE), dtype, -0.1, 0.1),
        hra_u=hra_u.astype(jnp.float32),
    )

    x = jax.random.normal(ks[6], (B, S, IN), dtype)
    task_ids = jnp.array([0, 2], dtype=jnp.int32)

    out_ref, logits_ref = moore_ref(x, task_ids, params, r)

    # --- f32 compute path: strict parity with the f32 module. ---
    prep_f32 = prepare_moore_weights(params, r=r, compute_dtype=jnp.float32)
    out, router_logits = moore_forward(x, task_ids, prep_f32)
    jax.block_until_ready((out, router_logits))
    assert out.shape == (B, S, OUT) and router_logits.shape == (B * S, E)
    assert jnp.allclose(out, out_ref, atol=1e-4, rtol=1e-4), "f32 result mismatch"
    assert jnp.allclose(router_logits, logits_ref, atol=1e-4, rtol=1e-4), "f32 logits mismatch"

    # --- bf16 compute path (production default): loose tolerance vs. the f32 reference. ---
    prep_bf16 = prepare_moore_weights(params, r=r)  # compute_dtype=bf16
    out_bf, logits_bf = moore_forward(x, task_ids, prep_bf16)
    jax.block_until_ready((out_bf, logits_bf))
    rel = jnp.linalg.norm(out_bf.astype(jnp.float32) - out_ref) / jnp.linalg.norm(out_ref)
    assert rel < 3e-2, f"bf16 relative error too large: {rel}"

    print("KERNEL_OK")
</pallas_src>

<mosaic_0001>
module attributes {stable_mosaic.version = 11 : i64} {
  func.func @moore_kernel(%arg0: i32, %arg1: i32, %arg2: memref<1x8x32xf32, #tpu.memory_space<vmem>>, %arg3: memref<32x256xf32, #tpu.memory_space<vmem>>, %arg4: memref<128x128xf32, #tpu.memory_space<vmem>>, %arg5: memref<1x1x128xf32, #tpu.memory_space<vmem>>, %arg6: memref<128x128xf32, #tpu.memory_space<vmem>>, %arg7: memref<1x8x128xf32, #tpu.memory_space<vmem>>, %arg8: memref<1x8x128xf32, #tpu.memory_space<vmem>>) attributes {dimension_semantics = [#tpu.dimension_semantics<parallel>, #tpu.dimension_semantics<parallel>], iteration_bounds = array<i64: 2, 1>, scalar_prefetch = 0 : i64, scratch_operands = 0 : i64, tpu.core_type = #tpu.core_type<tc>, window_params = [{transform_indices = @transform_0, window_bounds = array<i64: 1, 8, 32>}, {pipeline_mode = #tpu.pipeline_mode<synchronous>, transform_indices = @transform_1, window_bounds = array<i64: 32, 256>}, {pipeline_mode = #tpu.pipeline_mode<synchronous>, transform_indices = @transform_2, window_bounds = array<i64: 128, 128>}, {transform_indices = @transform_3, window_bounds = array<i64: 1, 1, 128>}, {pipeline_mode = #tpu.pipeline_mode<synchronous>, transform_indices = @transform_4, window_bounds = array<i64: 128, 128>}, {transform_indices = @transform_5, window_bounds = array<i64: 1, 8, 128>}, {transform_indices = @transform_6, window_bounds = array<i64: 1, 8, 128>}]} {
    %c0 = arith.constant 0 : index
    %c0_0 = arith.constant 0 : index
    %c0_1 = arith.constant 0 : index
    %0 = vector.load %arg2[%c0, %c0_0, %c0_1] : memref<1x8x32xf32, #tpu.memory_space<vmem>>, vector<1x8x32xf32>
    %1 = vector.shape_cast %0 : vector<1x8x32xf32> to vector<8x32xf32>
    %c0_2 = arith.constant 0 : index
    %c0_3 = arith.constant 0 : index
    %2 = vector.load %arg3[%c0_2, %c0_3] : memref<32x256xf32, #tpu.memory_space<vmem>>, vector<32x256xf32>
    %cst = arith.constant dense<0.000000e+00> : vector<8x256xf32>
    %3 = tpu.matmul %1, %2, %cst {dimension_numbers = #tpu.dot_dimension_numbers<[1], [0], [0], [1], [0, 0, 1, 1], [], []>} : vector<8x32xf32>, vector<32x256xf32>, vector<8x256xf32> -> vector<8x256xf32>
    %4 = vector.extract_strided_slice %3 {offsets = [0, 0], sizes = [8, 128], strides = [1, 1]} : vector<8x256xf32> to vector<8x128xf32>
    %5 = vector.extract_strided_slice %3 {offsets = [0, 128], sizes = [8, 128], strides = [1, 1]} : vector<8x256xf32> to vector<8x128xf32>
    %c0_4 = arith.constant 0 : index
    %c0_5 = arith.constant 0 : index
    %6 = vector.load %arg4[%c0_4, %c0_5] : memref<128x128xf32, #tpu.memory_space<vmem>>, vector<128x128xf32>
    %cst_6 = arith.constant dense<0.000000e+00> : vector<8x128xf32>
    %7 = tpu.matmul %5, %6, %cst_6 {dimension_numbers = #tpu.dot_dimension_numbers<[1], [0], [0], [1], [0, 0, 1, 1], [], []>} : vector<8x128xf32>, vector<128x128xf32>, vector<8x128xf32> -> vector<8x128xf32>
    %c0_7 = arith.constant 0 : index
    %c0_8 = arith.constant 0 : index
    %c0_9 = arith.constant 0 : index
    %8 = vector.load %arg5[%c0_7, %c0_8, %c0_9] : memref<1x1x128xf32, #tpu.memory_space<vmem>>, vector<1x1x128xf32>
    %9 = vector.shape_cast %8 : vector<1x1x128xf32> to vector<1x128xf32>
    %10 = vector.broadcast %9 : vector<1x128xf32> to vector<8x128xf32>
    %11 = arith.addf %7, %10 : vector<8x128xf32>
    %cst_10 = arith.constant 0.000000e+00 : f32
    %12 = vector.broadcast %cst_10 : f32 to vector<8x128xf32>
    %13 = arith.maximumf %11, %12 : vector<8x128xf32>
    %14 = arith.mulf %4, %13 : vector<8x128xf32>
    %c0_11 = arith.constant 0 : index
    %c0_12 = arith.constant 0 : index
    %15 = vector.load %arg6[%c0_11, %c0_12] : memref<128x128xf32, #tpu.memory_space<vmem>>, vector<128x128xf32>
    %cst_13 = arith.constant dense<0.000000e+00> : vector<8x128xf32>
    %16 = tpu.matmul %14, %15, %cst_13 {dimension_numbers = #tpu.dot_dimension_numbers<[1], [0], [0], [1], [0, 0, 1, 1], [], []>} : vector<8x128xf32>, vector<128x128xf32>, vector<8x128xf32> -> vector<8x128xf32>
    %c0_14 = arith.constant 0 : index
    %c0_15 = arith.constant 0 : index
    %c0_16 = arith.constant 0 : index
    %17 = vector.load %arg7[%c0_14, %c0_15, %c0_16] : memref<1x8x128xf32, #tpu.memory_space<vmem>>, vector<1x8x128xf32>
    %18 = vector.shape_cast %17 : vector<1x8x128xf32> to vector<8x128xf32>
    %19 = vector.shape_cast %16 : vector<8x128xf32> to vector<1x8x128xf32>
    tpu.vector_store %arg7[%c0_14, %c0_15, %c0_16], %19 {strides = array<i32>} : memref<1x8x128xf32, #tpu.memory_space<vmem>>, vector<1x8x128xf32>,
    %c0_17 = arith.constant 0 : index
    %c0_18 = arith.constant 0 : index
    %c0_19 = arith.constant 0 : index
    %20 = vector.load %arg8[%c0_17, %c0_18, %c0_19] : memref<1x8x128xf32, #tpu.memory_space<vmem>>, vector<1x8x128xf32>
    %21 = vector.shape_cast %20 : vector<1x8x128xf32> to vector<8x128xf32>
    %22 = vector.shape_cast %5 : vector<8x128xf32> to vector<1x8x128xf32>
    tpu.vector_store %arg8[%c0_17, %c0_18, %c0_19], %22 {strides = array<i32>} : memref<1x8x128xf32, #tpu.memory_space<vmem>>, vector<1x8x128xf32>,
    return
  }
  func.func @transform_0(%arg0: i32, %arg1: i32) -> (i32, i32, i32) {
    %c0_i32 = arith.constant 0 : i32
    %c0_i32_0 = arith.constant 0 : i32
    return %arg0, %arg1, %c0_i32 : i32, i32, i32
  }
  func.func @transform_1(%arg0: i32, %arg1: i32) -> (i32, i32) {
    %c0_i32 = arith.constant 0 : i32
    %c0_i32_0 = arith.constant 0 : i32
    %c0_i32_1 = arith.constant 0 : i32
    return %c0_i32, %c0_i32_0 : i32, i32
  }
  func.func @transform_2(%arg0: i32, %arg1: i32) -> (i32, i32) {
    %c0_i32 = arith.constant 0 : i32
    %c0_i32_0 = arith.constant 0 : i32
    %c0_i32_1 = arith.constant 0 : i32
    return %c0_i32, %c0_i32_0 : i32, i32
  }
  func.func @transform_3(%arg0: i32, %arg1: i32) -> (i32, i32, i32) {
    %c0_i32 = arith.constant 0 : i32
    %c0_i32_0 = arith.constant 0 : i32
    %c0_i32_1 = arith.constant 0 : i32
    return %arg0, %c0_i32, %c0_i32_0 : i32, i32, i32
  }
  func.func @transform_4(%arg0: i32, %arg1: i32) -> (i32, i32) {
    %c0_i32 = arith.constant 0 : i32
    %c0_i32_0 = arith.constant 0 : i32
    %c0_i32_1 = arith.constant 0 : i32
    return %c0_i32, %c0_i32_0 : i32, i32
  }
  func.func @transform_5(%arg0: i32, %arg1: i32) -> (i32, i32, i32) {
    %c0_i32 = arith.constant 0 : i32
    %c0_i32_0 = arith.constant 0 : i32
    return %arg0, %arg1, %c0_i32 : i32, i32, i32
  }
  func.func @transform_6(%arg0: i32, %arg1: i32) -> (i32, i32, i32) {
    %c0_i32 = arith.constant 0 : i32
    %c0_i32_0 = arith.constant 0 : i32
    return %arg0, %arg1, %c0_i32 : i32, i32, i32
  }
}

module attributes {stable_mosaic.version = 11 : i64} {
  func.func @moore_kernel(%arg0: i32, %arg1: i32, %arg2: memref<1x8x32xf32, #tpu.memory_space<vmem>>, %arg3: memref<32x256xf32, #tpu.memory_space<vmem>>, %arg4: memref<128x128xf32, #tpu.memory_space<vmem>>, %arg5: memref<1x1x128xf32, #tpu.memory_space<vmem>>, %arg6: memref<128x128xf32, #tpu.memory_space<vmem>>, %arg7: memref<1x8x128xf32, #tpu.memory_space<vmem>>, %arg8: memref<1x8x128xf32, #tpu.memory_space<vmem>>) attributes {dimension_semantics = [#tpu.dimension_semantics<parallel>, #tpu.dimension_semantics<parallel>], iteration_bounds = array<i64: 2, 1>, scalar_prefetch = 0 : i64, scratch_operands = 0 : i64, tpu.core_type = #tpu.core_type<tc>, window_params = [{transform_indices = @transform_0, window_bounds = array<i64: 1, 8, 32>}, {pipeline_mode = #tpu.pipeline_mode<synchronous>, transform_indices = @transform_1, window_bounds = array<i64: 32, 256>}, {pipeline_mode = #tpu.pipeline_mode<synchronous>, transform_indices = @transform_2, window_bounds = array<i64: 128, 128>}, {transform_indices = @transform_3, window_bounds = array<i64: 1, 1, 128>}, {pipeline_mode = #tpu.pipeline_mode<synchronous>, transform_indices = @transform_4, window_bounds = array<i64: 128, 128>}, {transform_indices = @transform_5, window_bounds = array<i64: 1, 8, 128>}, {transform_indices = @transform_6, window_bounds = array<i64: 1, 8, 128>}]} {
    %c0 = arith.constant 0 : index
    %c0_0 = arith.constant 0 : index
    %c0_1 = arith.constant 0 : index
    %0 = vector.load %arg2[%c0, %c0_0, %c0_1] : memref<1x8x32xf32, #tpu.memory_space<vmem>>, vector<1x8x32xf32>
    %1 = vector.shape_cast %0 : vector<1x8x32xf32> to vector<8x32xf32>
    %c0_2 = arith.constant 0 : index
    %c0_3 = arith.constant 0 : index
    %2 = vector.load %arg3[%c0_2, %c0_3] : memref<32x256xf32, #tpu.memory_space<vmem>>, vector<32x256xf32>
    %cst = arith.constant dense<0.000000e+00> : vector<8x256xf32>
    %3 = tpu.matmul %1, %2, %cst {dimension_numbers = #tpu.dot_dimension_numbers<[1], [0], [0], [1], [0, 0, 1, 1], [], []>} : vector<8x32xf32>, vector<32x256xf32>, vector<8x256xf32> -> vector<8x256xf32>
    %4 = vector.extract_strided_slice %3 {offsets = [0, 0], sizes = [8, 128], strides = [1, 1]} : vector<8x256xf32> to vector<8x128xf32>
    %5 = vector.extract_strided_slice %3 {offsets = [0, 128], sizes = [8, 128], strides = [1, 1]} : vector<8x256xf32> to vector<8x128xf32>
    %c0_4 = arith.constant 0 : index
    %c0_5 = arith.constant 0 : index
    %6 = vector.load %arg4[%c0_4, %c0_5] : memref<128x128xf32, #tpu.memory_space<vmem>>, vector<128x128xf32>
    %cst_6 = arith.constant dense<0.000000e+00> : vector<8x128xf32>
    %7 = tpu.matmul %5, %6, %cst_6 {dimension_numbers = #tpu.dot_dimension_numbers<[1], [0], [0], [1], [0, 0, 1, 1], [], []>} : vector<8x128xf32>, vector<128x128xf32>, vector<8x128xf32> -> vector<8x128xf32>
    %c0_7 = arith.constant 0 : index
    %c0_8 = arith.constant 0 : index
    %c0_9 = arith.constant 0 : index
    %8 = vector.load %arg5[%c0_7, %c0_8, %c0_9] : memref<1x1x128xf32, #tpu.memory_space<vmem>>, vector<1x1x128xf32>
    %9 = vector.shape_cast %8 : vector<1x1x128xf32> to vector<1x128xf32>
    %10 = vector.broadcast %9 : vector<1x128xf32> to vector<8x128xf32>
    %11 = arith.addf %7, %10 : vector<8x128xf32>
    %cst_10 = arith.constant 0.000000e+00 : f32
    %12 = vector.broadcast %cst_10 : f32 to vector<8x128xf32>
    %13 = arith.maximumf %11, %12 : vector<8x128xf32>
    %14 = arith.mulf %4, %13 : vector<8x128xf32>
    %c0_11 = arith.constant 0 : index
    %c0_12 = arith.constant 0 : index
    %15 = vector.load %arg6[%c0_11, %c0_12] : memref<128x128xf32, #tpu.memory_space<vmem>>, vector<128x128xf32>
    %cst_13 = arith.constant dense<0.000000e+00> : vector<8x128xf32>
    %16 = tpu.matmul %14, %15, %cst_13 {dimension_numbers = #tpu.dot_dimension_numbers<[1], [0], [0], [1], [0, 0, 1, 1], [], []>} : vector<8x128xf32>, vector<128x128xf32>, vector<8x128xf32> -> vector<8x128xf32>
    %c0_14 = arith.constant 0 : index
    %c0_15 = arith.constant 0 : index
    %c0_16 = arith.constant 0 : index
    %17 = vector.load %arg7[%c0_14, %c0_15, %c0_16] : memref<1x8x128xf32, #tpu.memory_space<vmem>>, vector<1x8x128xf32>
    %18 = vector.shape_cast %17 : vector<1x8x128xf32> to vector<8x128xf32>
    %19 = vector.shape_cast %16 : vector<8x128xf32> to vector<1x8x128xf32>
    tpu.vector_store %arg7[%c0_14, %c0_15, %c0_16], %19 {strides = array<i32>} : memref<1x8x128xf32, #tpu.memory_space<vmem>>, vector<1x8x128xf32>,
    %c0_17 = arith.constant 0 : index
    %c0_18 = arith.constant 0 : index
    %c0_19 = arith.constant 0 : index
    %20 = vector.load %arg8[%c0_17, %c0_18, %c0_19] : memref<1x8x128xf32, #tpu.memory_space<vmem>>, vector<1x8x128xf32>
    %21 = vector.shape_cast %20 : vector<1x8x128xf32> to vector<8x128xf32>
    %22 = vector.shape_cast %5 : vector<8x128xf32> to vector<1x8x128xf32>
    tpu.vector_store %arg8[%c0_17, %c0_18, %c0_19], %22 {strides = array<i32>} : memref<1x8x128xf32, #tpu.memory_space<vmem>>, vector<1x8x128xf32>,
    return
  }
  func.func @transform_0(%arg0: i32, %arg1: i32) -> (i32, i32, i32) {
    %c0_i32 = arith.constant 0 : i32
    %c0_i32_0 = arith.constant 0 : i32
    return %arg0, %arg1, %c0_i32 : i32, i32, i32
  }
  func.func @transform_1(%arg0: i32, %arg1: i32) -> (i32, i32) {
    %c0_i32 = arith.constant 0 : i32
    %c0_i32_0 = arith.constant 0 : i32
    %c0_i32_1 = arith.constant 0 : i32
    return %c0_i32, %c0_i32_0 : i32, i32
  }
  func.func @transform_2(%arg0: i32, %arg1: i32) -> (i32, i32) {
    %c0_i32 = arith.constant 0 : i32
    %c0_i32_0 = arith.constant 0 : i32
    %c0_i32_1 = arith.constant 0 : i32
    return %c0_i32, %c0_i32_0 : i32, i32
  }
  func.func @transform_3(%arg0: i32, %arg1: i32) -> (i32, i32, i32) {
    %c0_i32 = arith.constant 0 : i32
    %c0_i32_0 = arith.constant 0 : i32
    %c0_i32_1 = arith.constant 0 : i32
    return %arg0, %c0_i32, %c0_i32_0 : i32, i32, i32
  }
  func.func @transform_4(%arg0: i32, %arg1: i32) -> (i32, i32) {
    %c0_i32 = arith.constant 0 : i32
    %c0_i32_0 = arith.constant 0 : i32
    %c0_i32_1 = arith.constant 0 : i32
    return %c0_i32, %c0_i32_0 : i32, i32
  }
  func.func @transform_5(%arg0: i32, %arg1: i32) -> (i32, i32, i32) {
    %c0_i32 = arith.constant 0 : i32
    %c0_i32_0 = arith.constant 0 : i32
    return %arg0, %arg1, %c0_i32 : i32, i32, i32
  }
  func.func @transform_6(%arg0: i32, %arg1: i32) -> (i32, i32, i32) {
    %c0_i32 = arith.constant 0 : i32
    %c0_i32_0 = arith.constant 0 : i32
    return %arg0, %arg1, %c0_i32 : i32, i32, i32
  }
}

</mosaic_0001>

<bundles_post_ra>
// kernel: tpu_custom_call.1
= control target key start
LH: loop header
LB: loop body
LE: loop exit
PB: predicated region body
PF: predicated region fallthrough
CT: control target
= control target key end

     0   :  { %s1715_s0 = inlined_call_operand.hbm [shape: f32[2,8,32], index: 0, kind: input, shape index: {}]   ;;  %s1716_s1 = inlined_call_operand.hbm [shape: f32[32,256], index: 1, kind: input, shape index: {}]   ;;  %s1717_s2 = inlined_call_operand.hbm [shape: f32[128,128], index: 2, kind: input, shape index: {}]   ;;  %s1718_s3 = inlined_call_operand.vmem [shape: f32[2,1,128], index: 3, kind: input, shape index: {}]   ;;  %s1719_s4 = inlined_call_operand.hbm [shape: f32[128,128], index: 4, kind: input, shape index: {}]   ;;  %s1720_s5 = inlined_call_operand.hbm [shape: f32[2,8,128], index: 5, kind: output, shape index: {0}]   ;;  %s1721_s6 = inlined_call_operand.hbm [shape: f32[2,8,128], index: 6, kind: output, shape index: {1}]  }
   0x1   :  { %1728 = sst [smem:[#allocation20_spill]] %s1716_s1 }
   0x2   :  { %12 = vsyncpa [#allocation3], 0 }
   0x3   :  { %14 = vsyncpa [#allocation3 + $0x1], 0 }
   0x4   :  { %15 = vsyncpa [#allocation6], 0 }
   0x5   :  { %16 = vsyncpa [#allocation9], 0 }
   0x6   :  { %17 = vsyncpa [#allocation4], 0 }
   0x7   :  { %19 = vsyncpa [#allocation4 + $0x1], 0 }
   0x8   :  { %20 = vsyncpa [#allocation12], 0 }
   0x9   :  { %22 = vsyncpa [#allocation12 + $0x1], 0  ;;  %s1382_s21 = smov 0   ;;  %s1384_s22 = smov 0  }
   0xa   :  { %s1386_s23 = smov 0   ;;  %s1388_s24 = smov 0  }
   0xb   :  { %s1390_s25 = smov 0   ;;  %s1392_s26 = smov 0  }
   0xc LB: > { %1729 = sst [smem:[#allocation18_spill]] %s1312_s21  ;;  %s807_s27 = sadd.s32 4294967295, %s1332_s26   ;;  %s1332_s26 = sphi %s1392_s26, %s28_s26   ;;  %s1328_s25 = sphi %s1390_s25, %s1754_s25   ;;  %s1324_s24 = sphi %s1388_s24, %s1753_s24   ;;  %s1320_s23 = sphi %s1386_s23, %s1752_s23   ;;  %s1316_s22 = sphi %s1384_s22, %s1751_s22   ;;  %s1312_s21 = sphi %s1382_s21, %s1750_s21  }
   0xd   : > { %s808_s28 = sadd.s32 4294967294, %s1332_s26   ;;  %p62_p0 = scmp.ne.s32.totalorder %s1316_s22, %s1312_s21 }
   0xe   : > { %p1416_p1 = scmp.eq.s32.totalorder %s807_s27, 0  ;;  %p1420_p2 = scmp.eq.s32.totalorder %s807_s27, 1 }
   0xf   : > { %p183_p3 = scmp.eq.s32.totalorder %s808_s28, 1  ;;  %p809_p5 = scmp.ge.s32.totalorder %s1332_s26, 1 }
  0x10   : > { %s1730_s29 = scalar_select %p1416_p1, 1, 0 }
  0x11   : > { %s1731_s30 = scalar_select %p1420_p2, 1, 0 }
  0x12   : > { %p1426_p4 = por %p1416_p1, %p62_p0  ;;  %p1431_p6 = por %p183_p3, %p62_p0 }
  0x13   : > { %p218_p7 = scmp.lt.s32.totalorder %s1332_s26, 3  ;;  %s1334_s10 = smov [#allocation5]  }
  0x14   : > { %s1732_s7 = scalar_select %p1426_p4, 1, 0 }
  0x15   : > { %s1733_s8 = scalar_select %p1431_p6, 1, 0 }
  0x16   : > { %p1436_p8 = pnand %p809_p5, %p218_p7  ;;  %s230_s11 = sshll.u32 %s1334_s10, 4  ;;  %s1440_s11 = int_to_ptr.vmem [resolvable:$true] %s230_s11 }
  0x17   : > { %1734 = sst [smem:[#allocation19_spill]] %s1733_s8  ;;  %s1335_s13 = smov [#allocation7]  }
  0x18   : > { %s1735_s9 = scalar_select %p1436_p8, 1, 0 }
  0x19   : > { %p1009_p9 = pneg %p1436_p8  ;;  %s243_s14 = sshll.u32 %s1335_s13, 4  ;;  %s1451_s14 = int_to_ptr.vmem [resolvable:$true] %s243_s14 }
  0x1a   : > { %s1737_s1 = sld [smem:[#allocation20_spill]] }
  0x1b   : > { %p1447_p11 = pnand %p1009_p9, %p1416_p1 }
  0x1d   : > { %p1461_p13 = pneg %p1447_p11 }
  0x20   : > { %s1096_s17 = scalar_lea.hbm %s1737_s1, 1024 }
  0x21   : > { %p1097_p12 = scmp.ne.s32.totalorder %s1737_s1, %s1096_s17  ;;  %p1103_p5 = scmp.lt.u32.totalorder %s1096_s17, %s1737_s1 }
  0x23   : > { %p1099_p0 = pnand %p1461_p13, %p1097_p12 }
  0x25   : > { %p1100_p3 = pneg %p1099_p0 }
  0x27   : > { %p1105_p7 = pnand %p1103_p5, %p1100_p3 }
  0x29   : > { %1108 = shalt.err (!%p1105_p7)
}
  0x2a   : > { %s1109_s10 = scalar_lea.vmem %s1440_s11, 1024  ;;  %p1117_p1 = scmp.lt.s32.totalorder %s1440_s11, %s1440_s11 }
  0x2b   : > { %p1110_p9 = scmp.ne.s32.totalorder %s1440_s11, %s1109_s10  ;;  %p1118_p4 = scmp.lt.s32.totalorder %s1109_s10, %s1109_s10 }
  0x2d   : > { %p1112_p10 = pnand %p1110_p9, %p1461_p13  ;;  %p1119_p12 = por %p1118_p4, %p1117_p1 }
  0x2f   : > { %p1113_p6 = pneg %p1112_p10 }
  0x31   : > { %p1120_p0 = pnand %p1119_p12, %p1113_p6 }
  0x33   : > { %1123 = shalt.err (!%p1120_p0)
}
  0x34   : > { %s1336_s13 = smov 256   ;;  %s1337_s15 = smov 16  }
  0x35   : > { %1012 = dma.hbm_to_vmem [thread:$0]  (!%p1447_p11), %s1737_s1, 1024, %s1440_s11, [#allocation6], %s1336_s13, %s1336_s13, %s1337_s15  }
  0x36   : > { %s1124_s27 = scalar_lea.hbm %s1717_s2, 2048 }
  0x37   : > { %p1125_p1 = scmp.ne.s32.totalorder %s1717_s2, %s1124_s27  ;;  %p1131_p10 = scmp.lt.u32.totalorder %s1124_s27, %s1717_s2 }
  0x39   : > { %p1127_p4 = pnand %p1125_p1, %p1461_p13 }
  0x3b   : > { %p1128_p6 = pneg %p1127_p4 }
  0x3d   : > { %p1133_p3 = pnand %p1131_p10, %p1128_p6 }
  0x3f   : > { %1136 = shalt.err (!%p1133_p3)
}
  0x40   : > { %s1137_s11 = scalar_lea.vmem %s1451_s14, 2048  ;;  %p1145_p12 = scmp.lt.s32.totalorder %s1451_s14, %s1451_s14 }
  0x41   : > { %p1138_p5 = scmp.ne.s32.totalorder %s1451_s14, %s1137_s11  ;;  %p1146_p0 = scmp.lt.s32.totalorder %s1137_s11, %s1137_s11 }
  0x43   : > { %p1140_p7 = pnand %p1138_p5, %p1461_p13  ;;  %p1147_p1 = por %p1146_p0, %p1145_p12 }
  0x45   : > { %p1141_p9 = pneg %p1140_p7 }
  0x47   : > { %p1148_p4 = pnand %p1147_p1, %p1141_p9 }
  0x49   : > { %1151 = shalt.err (!%p1148_p4)
}
  0x4a   : > { %s1338_s8 = smov 128   ;;  %s1339_s21 = smov 8  }
  0x4b   : > { %1015 = dma.hbm_to_vmem [thread:$0]  (!%p1447_p11), %s1717_s2, 2048, %s1451_s14, [#allocation6], %s1338_s8, %s1338_s8, %s1339_s21  }
  0x4c   : > { %s1340_s16 = smov [#allocation8]   ;;  %s1152_s27 = scalar_lea.hbm %s1719_s4, 2048 }
  0x4d   : > { %s256_s17 = sshll.u32 %s1340_s16, 4  ;;  %p1153_p6 = scmp.ne.s32.totalorder %s1719_s4, %s1152_s27  ;;  %s257_s17 = int_to_ptr.vmem [resolvable:$true] %s256_s17 }
  0x4e   : > { %p1159_p5 = scmp.lt.u32.totalorder %s1152_s27, %s1719_s4 }
  0x4f   : > { %p1155_p10 = pnand %p1153_p6, %p1461_p13 }
  0x51   : > { %p1156_p3 = pneg %p1155_p10 }
  0x53   : > { %p1161_p7 = pnand %p1159_p5, %p1156_p3 }
  0x55   : > { %1164 = shalt.err (!%p1161_p7)
}
  0x56   : > { %s1165_s14 = scalar_lea.vmem %s257_s17, 2048  ;;  %p1173_p1 = scmp.lt.s32.totalorder %s257_s17, %s257_s17 }
  0x57   : > { %p1166_p9 = scmp.ne.s32.totalorder %s257_s17, %s1165_s14  ;;  %p1174_p4 = scmp.lt.s32.totalorder %s1165_s14, %s1165_s14 }
  0x59   : > { %p1168_p12 = pnand %p1166_p9, %p1461_p13  ;;  %p1175_p8 = por %p1174_p4, %p1173_p1 }
  0x5b   : > { %p1169_p0 = pneg %p1168_p12 }
  0x5d   : > { %p1176_p2 = pnand %p1175_p8, %p1169_p0 }
  0x5f   : > { %1179 = shalt.err (!%p1176_p2)
}
  0x60   : > { %1018 = dma.hbm_to_vmem [thread:$0]  (!%p1447_p11), %s1719_s4, 2048, %s257_s17, [#allocation9], %s1338_s8, %s1338_s8, %s1339_s21  }
  0x61   : > { %s40_s1 = sadd.s32 1, %s1328_s25  ;;  %s49_s20 = sadd.s32 1, %s1320_s23 }
  0x62   : > { %p42_p8 = scmp.ge.s32.totalorder %s40_s1, 2  ;;  %p56_p2 = scmp.ne.s32.totalorder %s1320_s23, %s1316_s22 }
  0x63   : > { %p57_p13 = scmp.eq.s32.totalorder %s1332_s26, 0  ;;  %p1740_p10 = scmp.ne.s32.totalorder %s1731_s30, 0 }
  0x64   : > { %s1756_s1 = smov (%p42_p8, %s40_s1), 0  ;;  %p1033_p11 = scmp.lt.s32.totalorder %s1332_s26, 2 }
  0x65   : > { %p1530_p6 = por %p57_p13, %p56_p2  ;;  %p1536_p3 = por %p1740_p10, %p56_p2 }
  0x66   : > { %s44_s18 = ssub.s32 %s1328_s25, %s1756_s1  ;;  %s270_s8 = sand.u32 1, %s1320_s23  }
  0x67   : > { %p47_p5 = scmp.eq.s32.totalorder %s44_s18, 0  ;;  %s814_s21 = sshll.u32 %s270_s8, 3 }
  0x68   : > { %s815_s19 = sshll.u32 %s1328_s25, 7  ;;  %s274_s30 = scalar_lea.vmem [#allocation2], %s814_s21 }
  0x69   : > { %s1545_s17 = scalar_select %p47_p5, %s1320_s23, %s49_s20  }
  0x6a   : > { %s1551_s10 = scalar_lea.hbm %s1715_s0, %s815_s19  ;;  %s282_s11 = sshll.u32 %s274_s30, 4  ;;  %s1553_s11 = int_to_ptr.vmem [resolvable:$true] %s282_s11 }
  0x6b   : > { %p1557_p7 = pnand %p1033_p11, %p1530_p6  ;;  %s271_s13 = scalar_lea.sflag [#allocation3], %s270_s8 }
  0x6c   : > { %s1180_s15 = scalar_lea.hbm %s1551_s10, 128  ;;  %s1185_s21 = scalar_lea.hbm %s1715_s0, 256 }
  0x6d   : > { %p1181_p9 = scmp.ne.s32.totalorder %s1551_s10, %s1180_s15  ;;  %p1182_p12 = pneg %p1557_p7 }
  0x6e   : > { %p1186_p4 = scmp.lt.u32.totalorder %s1551_s10, %s1715_s0  ;;  %p1187_p8 = scmp.lt.u32.totalorder %s1185_s21, %s1180_s15 }
  0x6f   : > { %p1183_p0 = pnand %p1182_p12, %p1181_p9  ;;  %p1189_p13 = scmp.lt.u32.totalorder %s1180_s15, %s1551_s10 }
  0x70   : > { %p1188_p2 = por %p1187_p8, %p1186_p4 }
  0x71   : > { %p1184_p1 = pneg %p1183_p0 }
  0x72   : > { %p1190_p6 = por %p1189_p13, %p1188_p2 }
  0x74   : > { %p1191_p10 = pnand %p1190_p6, %p1184_p1 }
  0x76   : > { %1194 = shalt.err (!%p1191_p10)
}
  0x77   : > { %s1195_s8 = scalar_lea.vmem %s1553_s11, 128  ;;  %s1341_s27 = smov [#allocation2]  }
  0x78   : > { %p1196_p11 = scmp.ne.s32.totalorder %s1553_s11, %s1195_s8  ;;  %s1200_s28 = sshll.u32 %s1341_s27, 4  ;;  %s1201_s28 = int_to_ptr.vmem [resolvable:$false] %s1200_s28 }
  0x79   : > { %s1202_s30 = scalar_lea.vmem %s1201_s28, 256  ;;  %p1203_p0 = scmp.lt.s32.totalorder %s1553_s11, %s1201_s28 }
  0x7a   : > { %p1198_p5 = pnand %p1196_p11, %p1182_p12  ;;  %p1204_p4 = scmp.lt.s32.totalorder %s1202_s30, %s1195_s8 }
  0x7c   : > { %p1199_p9 = pneg %p1198_p5  ;;  %p1205_p8 = por %p1204_p4, %p1203_p0 }
  0x7e   : > { %p1206_p2 = pnand %p1205_p8, %p1199_p9 }
  0x80   : > { %1209 = shalt.err (!%p1206_p2)
}
  0x81   : > { %1022 = dma.hbm_to_vmem [thread:$0]  (!%p1557_p7), %s1551_s10, 128, %s1553_s11, %s271_s13  }
  0x82   : > { %p1743_p1 = scmp.ne.s32.totalorder %s1735_s9, 0 }
  0x83   : > { %s1589_s15 = sand.u32 (!%p1743_p1), 1, %s1316_s22   ;;  %p1744_p12 = scmp.ne.s32.totalorder (!%p1743_p1), %s1732_s7, 0 }
  0x84   : > { %297 = sbr.rel (%p1743_p1) target bundleno = 813 (0x32d), region = 40  ;;  %s1592_s20 = sshll.u32 (!%p1743_p1), %s1589_s15, 3 }
  0x85   : > { %s300_s18 = scalar_lea.sflag (!%p1743_p1), [#allocation3], %s1589_s15  ;;  %s303_s21 = scalar_lea.vmem (!%p1743_p1), [#allocation2], %s1592_s20 }
  0x8b   : > { %1291 = dma.done.wait (%p1744_p12), %s300_s18, 128  }
  0x8c   : > { %1293 = vsyncadd (%p1744_p12), %s300_s18, 4294967168  ;;  %p1745_p7 = scmp.ne.s32.totalorder %s1730_s29, 0 }
  0x8e   : > { %1295 = dma.done.wait (%p1745_p7), [#allocation6], 3072  }
  0x8f   : > { %1297 = vsyncadd (%p1745_p7), [#allocation6], 4294964224 }
  0x90   : > { %1299 = dma.done.wait (%p1745_p7), [#allocation9], 2048  }
  0x91   : > { %1301 = vsyncadd (%p1745_p7), [#allocation9], 4294965248  ;;  %v1342_v0 = vmov 0.0   ;;  %v1343_v1 = vmov 0.0|0.0   ;;  %v357_v2 = vld [vmem:[#allocation5 + $0x8] sm:$0xff]  ;;  %v359_v3 = vld [vmem:[#allocation5 + $0x18] sm:$0xff] }
  0x92   : > { %432 = vmatprep.mubr.f32.mxu0 %v1342_v0  ;;  %943 = vmatprep.subr.bf16.mxu1 %v1343_v1  ;;  %v356_v4 = vld [vmem:[#allocation5] sm:$0xff]  ;;  %v935_v5 = vpack.c.bf16 %v359_v3, %v357_v2  ;;  %v358_v6 = vld [vmem:[#allocation5 + $0x10] sm:$0xff]  ;;  %v361_v7 = vld [vmem:[#allocation5 + $0x28] sm:$0xff]  ;;  %vm364_vm0 = vcmask 261120   ;;  %vm1344_vm1 = vmmov 0   ;;  %s351_s29 = scalar_lea.vmem [#allocation11], %s1592_s20 }
  0x93   : > { %v363_v8 = vld [vmem:[#allocation5 + $0x38] sm:$0xff]  ;;  %v937_v9 = vpack.c.bf16 %v358_v6, %v356_v4  ;;  %v360_v11 = vld [vmem:[#allocation5 + $0x20] sm:$0xff]  ;;  %v362_v12 = vld [vmem:[#allocation5 + $0x30] sm:$0xff]  ;;  %897 = vmatprep.mubr.msk.f32.mxu1 %vm1344_vm1, %v1342_v0  ;;  %p352_p13 = scmp.lt.s32.totalorder %s1324_s24, 1  ;;  %s656_s14 = sshll.u32 %s351_s29, 4  ;;  %s1636_s14 = int_to_ptr.vmem [resolvable:$true] %s656_s14 }
  0x94   : > { %v939_v10 = vpack.c.bf16 %v363_v8, %v361_v7  ;;  %936 = vmatprep.subr.bf16.mxu0 %v935_v5  ;;  %v439_v13 = vld [vmem:[#allocation7] sm:$0xff]  ;;  %v440_v14 = vld [vmem:[#allocation7 + $0x8] sm:$0xff]  ;;  %v441_v15 = vld [vmem:[#allocation7 + $0x10] sm:$0xff]  ;;  %v941_v16 = vpack.c.bf16 %v362_v12, %v360_v11  ;;  %s827_s13 = sshll.u32 %s1324_s24, 7  ;;  %s628_s27 = scalar_lea.sflag [#allocation12], %s1589_s15 }
  0x95   : > { %938 = vmatpush1.bf16.msra.mxu0 %v937_v9  ;;  %v944_v17 = vpack.c.bf16 %v440_v14, %v439_v13  ;;  %v442_v18 = vld [vmem:[#allocation7 + $0x18] sm:$0xff]  ;;  %v443_v20 = vld [vmem:[#allocation7 + $0x20] sm:$0xff]  ;;  %v444_v21 = vld [vmem:[#allocation7 + $0x28] sm:$0xff]  ;;  %s353_s7 = scalar_select %p352_p13, %s1324_s24, 1 }
  0x96   : > { %940 = vmatprep.subr.bf16.mxu0 %v939_v10  ;;  %v947_v19 = vpack.c.bf16 %v442_v18, %v441_v15  ;;  %v355_v22 = vld [vmem:[%s303_s21] sm:$0xff]  ;;  %v950_v23 = vpack.c.bf16 %v444_v21, %v443_v20  ;;  %v447_v27 = vld [vmem:[#allocation7 + $0x40] sm:$0xff]  ;;  %v448_v28 = vld [vmem:[#allocation7 + $0x48] sm:$0xff]  ;;  %s654_s8 = scalar_lea.hbm %s1721_s6, %s827_s13  ;;  %s1210_s28 = scalar_lea.vmem %s1636_s14, 128 }
  0x97   : > { %945 = vmatpush3.bf16.msra.mxu1 %v944_v17  ;;  %v445_v24 = vld [vmem:[#allocation7 + $0x30] sm:$0xff]  ;;  %v446_v25 = vld [vmem:[#allocation7 + $0x38] sm:$0xff]  ;;  %v956_v29 = vpack.c.bf16 %v448_v28, %v447_v27  ;;  %v451_v33 = vld [vmem:[#allocation7 + $0x60] sm:$0xff]  ;;  %s354_s11 = scalar_lea.vmem %s1718_s3, %s353_s7  ;;  %p1211_p6 = scmp.ne.s32.totalorder %s1636_s14, %s1210_s28 }
  0x98   : > { %946 = vmatprep.subr.bf16.mxu1 %v1343_v1  ;;  %v953_v26 = vpack.c.bf16 %v446_v25, %v445_v24  ;;  %v449_v30 = vld [vmem:[#allocation7 + $0x50] sm:$0xff]  ;;  %v450_v31 = vld [vmem:[#allocation7 + $0x58] sm:$0xff]  ;;  %v452_v34 = vld [vmem:[#allocation7 + $0x68] sm:$0xff]  ;;  %s1345_s30 = smov [#allocation11]  }
  0x99   : > { %942 = vmatpush1.bf16.msra.mxu0 %v941_v16  ;;  %v959_v32 = vpack.c.bf16 %v450_v31, %v449_v30  ;;  %v962_v35 = vpack.c.bf16 %v452_v34, %v451_v33  ;;  %v453_v36 = vld [vmem:[#allocation7 + $0x70] sm:$0xff]  ;;  %v454_v37 = vld [vmem:[#allocation7 + $0x78] sm:$0xff]  ;;  %v534_v39 = vld [vmem:[#allocation8] sm:$0xff]  ;;  %p1212_p10 = pnand %p1211_p6, %p1536_p3  ;;  %s1214_s18 = sshll.u32 %s1345_s30, 4  ;;  %s1215_s18 = int_to_ptr.vmem [resolvable:$false] %s1214_s18 }
  0x9a   : > { %967 = vmatprep.subr.bf16.mxu0 %v1343_v1  ;;  %v965_v38 = vpack.c.bf16 %v454_v37, %v453_v36  ;;  %v535_v40 = vld [vmem:[#allocation8 + $0x8] sm:$0xff]  ;;  %v536_v41 = vld [vmem:[#allocation8 + $0x10] sm:$0xff]  ;;  %v537_v43 = vld [vmem:[#allocation8 + $0x18] sm:$0xff]  ;;  %s1216_s21 = scalar_lea.vmem %s1215_s18, 256  ;;  %p1217_p5 = scmp.lt.s32.totalorder %s1636_s14, %s1215_s18 }
  0x9b   : > { %948 = vmatpush3.bf16.msra.mxu1 %v947_v19  ;;  %v968_v42 = vpack.c.bf16 %v535_v40, %v534_v39  ;;  %v971_v44 = vpack.c.bf16 %v537_v43, %v536_v41  ;;  %v538_v45 = vld [vmem:[#allocation8 + $0x20] sm:$0xff]  ;;  %v539_v46 = vld [vmem:[#allocation8 + $0x28] sm:$0xff]  ;;  %v540_v48 = vld [vmem:[#allocation8 + $0x30] sm:$0xff]  ;;  %p1213_p11 = pneg %p1212_p10  ;;  %p1218_p9 = scmp.lt.s32.totalorder %s1216_s21, %s1210_s28 }
  0x9c   : > { %823 = vmatmul.mubr.msk.f32.vlgmr.msra.gmra.mrb[0].mxu0 %vm364_vm0, %v355_v22  ;;  %949 = vmatprep.subr.bf16.mxu1 %v1343_v1  ;;  %v974_v47 = vpack.c.bf16 %v539_v46, %v538_v45  ;;  %v541_v49 = vld [vmem:[#allocation8 + $0x38] sm:$0xff]  ;;  %v542_v51 = vld [vmem:[#allocation8 + $0x40] sm:$0xff]  ;;  %v543_v52 = vld [vmem:[#allocation8 + $0x48] sm:$0xff] }
  0x9d   : > { %932 = vmatprep.mubr.msk.f32.mxu0 %vm1344_vm1, %v1342_v0  ;;  %969 = vmatpush3.bf16.msra.mxu0 %v968_v42  ;;  %v977_v50 = vpack.c.bf16 %v541_v49, %v540_v48  ;;  %v980_v53 = vpack.c.bf16 %v543_v52, %v542_v51  ;;  %v544_v54 = vld [vmem:[#allocation8 + $0x50] sm:$0xff]  ;;  %v545_v55 = vld [vmem:[#allocation8 + $0x58] sm:$0xff]  ;;  %v546_v59 = vld [vmem:[#allocation8 + $0x60] sm:$0xff]  ;;  %p1219_p0 = por %p1218_p9, %p1217_p5 }
  0x9e   : > { %970 = vmatprep.subr.bf16.mxu0 %v1343_v1  ;;  %v983_v56 = vpack.c.bf16 %v545_v55, %v544_v54  ;;  %v547_v60 = vld [vmem:[#allocation8 + $0x68] sm:$0xff]  ;;  %v548_v62 = vld [vmem:[#allocation8 + $0x70] sm:$0xff]  ;;  %v549_v63 = vld [vmem:[#allocation8 + $0x78] sm:$0xff] }
  0x9f   : > { %951 = vmatpush3.bf16.msra.mxu1 %v950_v23  ;;  %v986_v61 = vpack.c.bf16 %v547_v60, %v546_v59  ;;  %v989_v0 = vpack.c.bf16 %v549_v63, %v548_v62  ;;  %v824_v2 = vld [vmem:[%s354_s11] ss:$0 sm:$0xff]  ;;  %p1220_p4 = pnand %p1219_p0, %p1213_p11 }
  0xa0   : > { %952 = vmatprep.subr.bf16.mxu1 %v1343_v1 }
  0xa1   : > { %972 = vmatpush3.bf16.msra.mxu0 %v971_v44 }
  0xa2   : > { %973 = vmatprep.subr.bf16.mxu0 %v1343_v1 }
  0xa3   : > { %954 = vmatpush3.bf16.msra.mxu1 %v953_v26 }
  0xa4   : > { %955 = vmatprep.subr.bf16.mxu1 %v1343_v1 }
  0xa5   : > { %975 = vmatpush3.bf16.msra.mxu0 %v974_v47 }
  0xa6   : > { %976 = vmatprep.subr.bf16.mxu0 %v1343_v1 }
  0xa7   : > { %957 = vmatpush3.bf16.msra.mxu1 %v956_v29 }
  0xa8   : > { %958 = vmatprep.subr.bf16.mxu1 %v1343_v1 }
  0xa9   : > { %978 = vmatpush3.bf16.msra.mxu0 %v977_v50 }
  0xaa   : > { %979 = vmatprep.subr.bf16.mxu0 %v1343_v1 }
  0xab   : > { %960 = vmatpush3.bf16.msra.mxu1 %v959_v32 }
  0xac   : > { %961 = vmatprep.subr.bf16.mxu1 %v1343_v1 }
  0xad   : > { %981 = vmatpush3.bf16.msra.mxu0 %v980_v53 }
  0xae   : > { %982 = vmatprep.subr.bf16.mxu0 %v1343_v1 }
  0xaf   : > { %963 = vmatpush3.bf16.msra.mxu1 %v962_v35 }
  0xb0   : > { %964 = vmatprep.subr.bf16.mxu1 %v1343_v1 }
  0xb1   : > { %984 = vmatpush3.bf16.msra.mxu0 %v983_v56 }
  0xb2   : > { %985 = vmatprep.subr.bf16.mxu0 %v1343_v1 }
  0xb3   : > { %966 = vmatpush3.bf16.msra.mxu1 %v965_v38 }
  0xb5   : > { %987 = vmatpush3.bf16.msra.mxu0 %v986_v61 }
  0xb6   : > { %988 = vmatprep.subr.bf16.mxu0 %v1343_v1 }
  0xb9   : > { %990 = vmatpush3.bf16.msra.mxu0 %v989_v0 }
 0x16f   : > { %v434_v57 = vpop.f32.mrb[0].mxu0 }
 0x170   : > { %v436_v58 = vpop.f32.mrb[1].mxu0 }
 0x171   : > { %621 = vst [vmem:[%s351_s29] sm:$0xff] %v436_v58  ;;  %898 = vmatmul.mubr.f32.vlgmr.msra.gmra.mrb[0].mxu1 %v436_v58 }
 0x244   : > { %v528_v3 = vpop.f32.mrb[0].mxu1 }
 0x245   : > { %v529_v4 = vadd.f32 %v824_v2, %v528_v3  ;;  %v899_v5 = vpop.f32.mrb[1].mxu1 }
 0x247   : > { %v532_v6 = vmax.f32 %v529_v4, 0.0 }
 0x249   : > { %v533_v1 = vmul.f32 %v532_v6, %v434_v57 }
 0x24b   : > { %933 = vmatmul.mubr.f32.vlgmr.msra.gmra.mrb[2].mxu0 %v533_v1 }
 0x24c   : > { %1223 = shalt.err (!%p1220_p4)
}
 0x24d   : > { %s1224_s29 = scalar_lea.hbm %s654_s8, 128  ;;  %s1228_s10 = scalar_lea.hbm %s1721_s6, 256 }
 0x24e   : > { %p1225_p8 = scmp.ne.s32.totalorder %s654_s8, %s1224_s29  ;;  %p1229_p12 = scmp.lt.u32.totalorder %s654_s8, %s1721_s6 }
 0x24f   : > { %p1230_p7 = scmp.lt.u32.totalorder %s1228_s10, %s1224_s29  ;;  %p1232_p6 = scmp.lt.u32.totalorder %s1224_s29, %s654_s8 }
 0x250   : > { %p1226_p2 = pnand %p1225_p8, %p1536_p3 }
 0x251   : > { %p1231_p13 = por %p1230_p7, %p1229_p12 }
 0x252   : > { %p1227_p1 = pneg %p1226_p2 }
 0x253   : > { %p1233_p10 = por %p1232_p6, %p1231_p13 }
 0x255   : > { %p1234_p11 = pnand %p1233_p10, %p1227_p1 }
 0x257   : > { %1237 = shalt.err (!%p1234_p11)
}
 0x258   : > { %1006 = dma.vmem_to_hbm [thread:$0]  (%p1536_p3), %s1636_s14, 128, %s654_s8, %s628_s27  }
 0x259   : > { %s344_s19 = scalar_lea.vmem [#allocation10], %s1592_s20  ;;  %s1668_s21 = scalar_lea.hbm %s1720_s5, %s827_s13 }
 0x25a   : > { %s642_s28 = sshll.u32 %s344_s19, 4  ;;  %s623_s29 = scalar_lea.sflag [#allocation4], %s1589_s15  ;;  %s1661_s28 = int_to_ptr.vmem [resolvable:$true] %s642_s28 }
 0x25b   : > { %s1238_s7 = scalar_lea.vmem %s1661_s28, 128  ;;  %s1346_s20 = smov [#allocation10]  }
 0x25c   : > { %p1239_p5 = scmp.ne.s32.totalorder %s1661_s28, %s1238_s7  ;;  %s1242_s14 = sshll.u32 %s1346_s20, 4  ;;  %s1243_s14 = int_to_ptr.vmem [resolvable:$false] %s1242_s14 }
 0x25d   : > { %s1244_s24 = scalar_lea.vmem %s1243_s14, 256  ;;  %p1245_p4 = scmp.lt.s32.totalorder %s1661_s28, %s1243_s14 }
 0x25e   : > { %p1240_p9 = pnand %p1239_p5, %p1536_p3  ;;  %p1246_p8 = scmp.lt.s32.totalorder %s1244_s24, %s1238_s7 }
 0x260   : > { %p1241_p0 = pneg %p1240_p9  ;;  %p1247_p2 = por %p1246_p8, %p1245_p4 }
 0x262   : > { %p1248_p1 = pnand %p1247_p2, %p1241_p0 }
 0x31e   : > { %v616_v7 = vpop.f32.mrb[2].mxu0 }
 0x31f   : > { %620 = vst [vmem:[%s344_s19] sm:$0xff] %v616_v7  ;;  %v934_v8 = vpop.f32.mrb[3].mxu0 }
 0x320   : > { %1251 = shalt.err (!%p1248_p1)
}
 0x321   : > { %s1252_s15 = scalar_lea.hbm %s1668_s21, 128  ;;  %s1256_s27 = scalar_lea.hbm %s1720_s5, 256 }
 0x322   : > { %p1253_p12 = scmp.ne.s32.totalorder %s1668_s21, %s1252_s15  ;;  %p1257_p6 = scmp.lt.u32.totalorder %s1668_s21, %s1720_s5 }
 0x323   : > { %p1258_p10 = scmp.lt.u32.totalorder %s1256_s27, %s1252_s15  ;;  %p1260_p5 = scmp.lt.u32.totalorder %s1252_s15, %s1668_s21 }
 0x324   : > { %p1254_p7 = pnand %p1253_p12, %p1536_p3 }
 0x325   : > { %p1259_p11 = por %p1258_p10, %p1257_p6 }
 0x326   : > { %p1255_p13 = pneg %p1254_p7 }
 0x327   : > { %p1261_p9 = por %p1260_p5, %p1259_p11 }
 0x329   : > { %p1262_p0 = pnand %p1261_p9, %p1255_p13 }
 0x32b   : > { %1265 = shalt.err (!%p1262_p0)
}
 0x32c   : > { %1005 = dma.vmem_to_hbm [thread:$0]  (%p1536_p3), %s1661_s28, 128, %s1668_s21, %s623_s29  }
 0x32d PF: > { %s1746_s11 = sld [smem:[#allocation18_spill]]  ;;  %s1747_s12 = sld [smem:[#allocation19_spill]] }
 0x32e   : > { %p1749_p8 = scmp.ge.s32.totalorder %s1332_s26, 2 }
 0x333   : > { %s668_s19 = sand.u32 1, %s1746_s11   ;;  %p1748_p4 = scmp.ne.s32.totalorder %s1747_s12, 0 }
 0x334   : > { %s669_s30 = scalar_lea.sflag [#allocation4], %s668_s19 }
 0x335   : > { %p1024_p2 = pnand %p1749_p8, %p1748_p4 }
 0x337   : > { %1303 = dma.done.wait (!%p1024_p2), %s669_s30, 128  }
 0x338   : > { %1305 = vsyncadd (!%p1024_p2), %s669_s30, 4294967168  ;;  %s678_s18 = scalar_lea.sflag [#allocation12], %s668_s19 }
 0x339   : > { %1307 = dma.done.wait (!%p1024_p2), %s678_s18, 128  }
 0x33a   : > { %1309 = vsyncadd (!%p1024_p2), %s678_s18, 4294967168  ;;  %s28_s26 = sadd.s32 1, %s1332_s26   ;;  %s1750_s21 = smov %s1316_s22 }
 0x33b   : > { %p25_p1 = scmp.ge.s32.totalorder %s28_s26, 4   ;;  %s1751_s22 = smov %s1320_s23 }
 0x33c   : > { %s1752_s23 = smov %s1545_s17  ;;  %s1753_s24 = smov %s1328_s25 }
 0x33d   : > { %s1754_s25 = smov %s1756_s1  ;;  %27 = sbr.rel (!%p25_p1) target bundleno = 12 (0xc), region = 117 }
 0x344   :  { %683 = vsyncpa [#allocation3], 1 }
 0x345   :  { %685 = vsyncpa [#allocation3 + $0x1], 1 }
 0x346   :  { %686 = vsyncpa [#allocation6], 1 }
 0x347   :  { %687 = vsyncpa [#allocation9], 1 }
 0x348   :  { %688 = vsyncpa [#allocation4], 1 }
 0x349   :  { %690 = vsyncpa [#allocation4 + $0x1], 1 }
 0x34a   :  { %691 = vsyncpa [#allocation12], 1 }
 0x34b   :  { %693 = vsyncpa [#allocation12 + $0x1], 1 }

// kernel: tpu_custom_call.1
= control target key start
LH: loop header
LB: loop body
LE: loop exit
PB: predicated region body
PF: predicated region fallthrough
CT: control target
= control target key end

     0   :  { %s1715_s0 = inlined_call_operand.hbm [shape: f32[2,8,32], index: 0, kind: input, shape index: {}]   ;;  %s1716_s1 = inlined_call_operand.hbm [shape: f32[32,256], index: 1, kind: input, shape index: {}]   ;;  %s1717_s2 = inlined_call_operand.hbm [shape: f32[128,128], index: 2, kind: input, shape index: {}]   ;;  %s1718_s3 = inlined_call_operand.vmem [shape: f32[2,1,128], index: 3, kind: input, shape index: {}]   ;;  %s1719_s4 = inlined_call_operand.hbm [shape: f32[128,128], index: 4, kind: input, shape index: {}]   ;;  %s1720_s5 = inlined_call_operand.hbm [shape: f32[2,8,128], index: 5, kind: output, shape index: {0}]   ;;  %s1721_s6 = inlined_call_operand.hbm [shape: f32[2,8,128], index: 6, kind: output, shape index: {1}]  }
   0x1   :  { %1728 = sst [smem:[#allocation20_spill]] %s1716_s1 }
   0x2   :  { %12 = vsyncpa [#allocation3], 0 }
   0x3   :  { %14 = vsyncpa [#allocation3 + $0x1], 0 }
   0x4   :  { %15 = vsyncpa [#allocation6], 0 }
   0x5   :  { %16 = vsyncpa [#allocation9], 0 }
   0x6   :  { %17 = vsyncpa [#allocation4], 0 }
   0x7   :  { %19 = vsyncpa [#allocation4 + $0x1], 0 }
   0x8   :  { %20 = vsyncpa [#allocation12], 0 }
   0x9   :  { %22 = vsyncpa [#allocation12 + $0x1], 0  ;;  %s1382_s21 = smov 0   ;;  %s1384_s22 = smov 0  }
   0xa   :  { %s1386_s23 = smov 0   ;;  %s1388_s24 = smov 0  }
   0xb   :  { %s1390_s25 = smov 0   ;;  %s1392_s26 = smov 0  }
   0xc LB: > { %1729 = sst [smem:[#allocation18_spill]] %s1312_s21  ;;  %s807_s27 = sadd.s32 4294967295, %s1332_s26   ;;  %s1332_s26 = sphi %s1392_s26, %s28_s26   ;;  %s1328_s25 = sphi %s1390_s25, %s1754_s25   ;;  %s1324_s24 = sphi %s1388_s24, %s1753_s24   ;;  %s1320_s23 = sphi %s1386_s23, %s1752_s23   ;;  %s1316_s22 = sphi %s1384_s22, %s1751_s22   ;;  %s1312_s21 = sphi %s1382_s21, %s1750_s21  }
   0xd   : > { %s808_s28 = sadd.s32 4294967294, %s1332_s26   ;;  %p62_p0 = scmp.ne.s32.totalorder %s1316_s22, %s1312_s21 }
   0xe   : > { %p1416_p1 = scmp.eq.s32.totalorder %s807_s27, 0  ;;  %p1420_p2 = scmp.eq.s32.totalorder %s807_s27, 1 }
   0xf   : > { %p183_p3 = scmp.eq.s32.totalorder %s808_s28, 1  ;;  %p809_p5 = scmp.ge.s32.totalorder %s1332_s26, 1 }
  0x10   : > { %s1730_s29 = scalar_select %p1416_p1, 1, 0 }
  0x11   : > { %s1731_s30 = scalar_select %p1420_p2, 1, 0 }
  0x12   : > { %p1426_p4 = por %p1416_p1, %p62_p0  ;;  %p1431_p6 = por %p183_p3, %p62_p0 }
  0x13   : > { %p218_p7 = scmp.lt.s32.totalorder %s1332_s26, 3  ;;  %s1334_s10 = smov [#allocation5]  }
  0x14   : > { %s1732_s7 = scalar_select %p1426_p4, 1, 0 }
  0x15   : > { %s1733_s8 = scalar_select %p1431_p6, 1, 0 }
  0x16   : > { %p1436_p8 = pnand %p809_p5, %p218_p7  ;;  %s230_s11 = sshll.u32 %s1334_s10, 4  ;;  %s1440_s11 = int_to_ptr.vmem [resolvable:$true] %s230_s11 }
  0x17   : > { %1734 = sst [smem:[#allocation19_spill]] %s1733_s8  ;;  %s1335_s13 = smov [#allocation7]  }
  0x18   : > { %s1735_s9 = scalar_select %p1436_p8, 1, 0 }
  0x19   : > { %p1009_p9 = pneg %p1436_p8  ;;  %s243_s14 = sshll.u32 %s1335_s13, 4  ;;  %s1451_s14 = int_to_ptr.vmem [resolvable:$true] %s243_s14 }
  0x1a   : > { %s1737_s1 = sld [smem:[#allocation20_spill]] }
  0x1b   : > { %p1447_p11 = pnand %p1009_p9, %p1416_p1 }
  0x1d   : > { %p1461_p13 = pneg %p1447_p11 }
  0x20   : > { %s1096_s17 = scalar_lea.hbm %s1737_s1, 1024 }
  0x21   : > { %p1097_p12 = scmp.ne.s32.totalorder %s1737_s1, %s1096_s17  ;;  %p1103_p5 = scmp.lt.u32.totalorder %s1096_s17, %s1737_s1 }
  0x23   : > { %p1099_p0 = pnand %p1461_p13, %p1097_p12 }
  0x25   : > { %p1100_p3 = pneg %p1099_p0 }
  0x27   : > { %p1105_p7 = pnand %p1103_p5, %p1100_p3 }
  0x29   : > { %1108 = shalt.err (!%p1105_p7)
}
  0x2a   : > { %s1109_s10 = scalar_lea.vmem %s1440_s11, 1024  ;;  %p1117_p1 = scmp.lt.s32.totalorder %s1440_s11, %s1440_s11 }
  0x2b   : > { %p1110_p9 = scmp.ne.s32.totalorder %s1440_s11, %s1109_s10  ;;  %p1118_p4 = scmp.lt.s32.totalorder %s1109_s10, %s1109_s10 }
  0x2d   : > { %p1112_p10 = pnand %p1110_p9, %p1461_p13  ;;  %p1119_p12 = por %p1118_p4, %p1117_p1 }
  0x2f   : > { %p1113_p6 = pneg %p1112_p10 }
  0x31   : > { %p1120_p0 = pnand %p1119_p12, %p1113_p6 }
  0x33   : > { %1123 = shalt.err (!%p1120_p0)
}
  0x34   : > { %s1336_s13 = smov 256   ;;  %s1337_s15 = smov 16  }
  0x35   : > { %1012 = dma.hbm_to_vmem [thread:$0]  (!%p1447_p11), %s1737_s1, 1024, %s1440_s11, [#allocation6], %s1336_s13, %s1336_s13, %s1337_s15  }
  0x36   : > { %s1124_s27 = scalar_lea.hbm %s1717_s2, 2048 }
  0x37   : > { %p1125_p1 = scmp.ne.s32.totalorder %s1717_s2, %s1124_s27  ;;  %p1131_p10 = scmp.lt.u32.totalorder %s1124_s27, %s1717_s2 }
  0x39   : > { %p1127_p4 = pnand %p1125_p1, %p1461_p13 }
  0x3b   : > { %p1128_p6 = pneg %p1127_p4 }
  0x3d   : > { %p1133_p3 = pnand %p1131_p10, %p1128_p6 }
  0x3f   : > { %1136 = shalt.err (!%p1133_p3)
}
  0x40   : > { %s1137_s11 = scalar_lea.vmem %s1451_s14, 2048  ;;  %p1145_p12 = scmp.lt.s32.totalorder %s1451_s14, %s1451_s14 }
  0x41   : > { %p1138_p5 = scmp.ne.s32.totalorder %s1451_s14, %s1137_s11  ;;  %p1146_p0 = scmp.lt.s32.totalorder %s1137_s11, %s1137_s11 }
  0x43   : > { %p1140_p7 = pnand %p1138_p5, %p1461_p13  ;;  %p1147_p1 = por %p1146_p0, %p1145_p12 }
  0x45   : > { %p1141_p9 = pneg %p1140_p7 }
  0x47   : > { %p1148_p4 = pnand %p1147_p1, %p1141_p9 }
  0x49   : > { %1151 = shalt.err (!%p1148_p4)
}
  0x4a   : > { %s1338_s8 = smov 128   ;;  %s1339_s21 = smov 8  }
  0x4b   : > { %1015 = dma.hbm_to_vmem [thread:$0]  (!%p1447_p11), %s1717_s2, 2048, %s1451_s14, [#allocation6], %s1338_s8, %s1338_s8, %s1339_s21  }
  0x4c   : > { %s1340_s16 = smov [#allocation8]   ;;  %s1152_s27 = scalar_lea.hbm %s1719_s4, 2048 }
  0x4d   : > { %s256_s17 = sshll.u32 %s1340_s16, 4  ;;  %p1153_p6 = scmp.ne.s32.totalorder %s1719_s4, %s1152_s27  ;;  %s257_s17 = int_to_ptr.vmem [resolvable:$true] %s256_s17 }
  0x4e   : > { %p1159_p5 = scmp.lt.u32.totalorder %s1152_s27, %s1719_s4 }
  0x4f   : > { %p1155_p10 = pnand %p1153_p6, %p1461_p13 }
  0x51   : > { %p1156_p3 = pneg %p1155_p10 }
  0x53   : > { %p1161_p7 = pnand %p1159_p5, %p1156_p3 }
  0x55   : > { %1164 = shalt.err (!%p1161_p7)
}
  0x56   : > { %s1165_s14 = scalar_lea.vmem %s257_s17, 2048  ;;  %p1173_p1 = scmp.lt.s32.totalorder %s257_s17, %s257_s17 }
  0x57   : > { %p1166_p9 = scmp.ne.s32.totalorder %s257_s17, %s1165_s14  ;;  %p1174_p4 = scmp.lt.s32.totalorder %s1165_s14, %s1165_s14 }
  0x59   : > { %p1168_p12 = pnand %p1166_p9, %p1461_p13  ;;  %p1175_p8 = por %p1174_p4, %p1173_p1 }
  0x5b   : > { %p1169_p0 = pneg %p1168_p12 }
  0x5d   : > { %p1176_p2 = pnand %p1175_p8, %p1169_p0 }
  0x5f   : > { %1179 = shalt.err (!%p1176_p2)
}
  0x60   : > { %1018 = dma.hbm_to_vmem [thread:$0]  (!%p1447_p11), %s1719_s4, 2048, %s257_s17, [#allocation9], %s1338_s8, %s1338_s8, %s1339_s21  }
  0x61   : > { %s40_s1 = sadd.s32 1, %s1328_s25  ;;  %s49_s20 = sadd.s32 1, %s1320_s23 }
  0x62   : > { %p42_p8 = scmp.ge.s32.totalorder %s40_s1, 2  ;;  %p56_p2 = scmp.ne.s32.totalorder %s1320_s23, %s1316_s22 }
  0x63   : > { %p57_p13 = scmp.eq.s32.totalorder %s1332_s26, 0  ;;  %p1740_p10 = scmp.ne.s32.totalorder %s1731_s30, 0 }
  0x64   : > { %s1756_s1 = smov (%p42_p8, %s40_s1), 0  ;;  %p1033_p11 = scmp.lt.s32.totalorder %s1332_s26, 2 }
  0x65   : > { %p1530_p6 = por %p57_p13, %p56_p2  ;;  %p1536_p3 = por %p1740_p10, %p56_p2 }
  0x66   : > { %s44_s18 = ssub.s32 %s1328_s25, %s1756_s1  ;;  %s270_s8 = sand.u32 1, %s1320_s23  }
  0x67   : > { %p47_p5 = scmp.eq.s32.totalorder %s44_s18, 0  ;;  %s814_s21 = sshll.u32 %s270_s8, 3 }
  0x68   : > { %s815_s19 = sshll.u32 %s1328_s25, 7  ;;  %s274_s30 = scalar_lea.vmem [#allocation2], %s814_s21 }
  0x69   : > { %s1545_s17 = scalar_select %p47_p5, %s1320_s23, %s49_s20  }
  0x6a   : > { %s1551_s10 = scalar_lea.hbm %s1715_s0, %s815_s19  ;;  %s282_s11 = sshll.u32 %s274_s30, 4  ;;  %s1553_s11 = int_to_ptr.vmem [resolvable:$true] %s282_s11 }
  0x6b   : > { %p1557_p7 = pnand %p1033_p11, %p1530_p6  ;;  %s271_s13 = scalar_lea.sflag [#allocation3], %s270_s8 }
  0x6c   : > { %s1180_s15 = scalar_lea.hbm %s1551_s10, 128  ;;  %s1185_s21 = scalar_lea.hbm %s1715_s0, 256 }
  0x6d   : > { %p1181_p9 = scmp.ne.s32.totalorder %s1551_s10, %s1180_s15  ;;  %p1182_p12 = pneg %p1557_p7 }
  0x6e   : > { %p1186_p4 = scmp.lt.u32.totalorder %s1551_s10, %s1715_s0  ;;  %p1187_p8 = scmp.lt.u32.totalorder %s1185_s21, %s1180_s15 }
  0x6f   : > { %p1183_p0 = pnand %p1182_p12, %p1181_p9  ;;  %p1189_p13 = scmp.lt.u32.totalorder %s1180_s15, %s1551_s10 }
  0x70   : > { %p1188_p2 = por %p1187_p8, %p1186_p4 }
  0x71   : > { %p1184_p1 = pneg %p1183_p0 }
  0x72   : > { %p1190_p6 = por %p1189_p13, %p1188_p2 }
  0x74   : > { %p1191_p10 = pnand %p1190_p6, %p1184_p1 }
  0x76   : > { %1194 = shalt.err (!%p1191_p10)
}
  0x77   : > { %s1195_s8 = scalar_lea.vmem %s1553_s11, 128  ;;  %s1341_s27 = smov [#allocation2]  }
  0x78   : > { %p1196_p11 = scmp.ne.s32.totalorder %s1553_s11, %s1195_s8  ;;  %s1200_s28 = sshll.u32 %s1341_s27, 4  ;;  %s1201_s28 = int_to_ptr.vmem [resolvable:$false] %s1200_s28 }
  0x79   : > { %s1202_s30 = scalar_lea.vmem %s1201_s28, 256  ;;  %p1203_p0 = scmp.lt.s32.totalorder %s1553_s11, %s1201_s28 }
  0x7a   : > { %p1198_p5 = pnand %p1196_p11, %p1182_p12  ;;  %p1204_p4 = scmp.lt.s32.totalorder %s1202_s30, %s1195_s8 }
  0x7c   : > { %p1199_p9 = pneg %p1198_p5  ;;  %p1205_p8 = por %p1204_p4, %p1203_p0 }
  0x7e   : > { %p1206_p2 = pnand %p1205_p8, %p1199_p9 }
  0x80   : > { %1209 = shalt.err (!%p1206_p2)
}
  0x81   : > { %1022 = dma.hbm_to_vmem [thread:$0]  (!%p1557_p7), %s1551_s10, 128, %s1553_s11, %s271_s13  }
  0x82   : > { %p1743_p1 = scmp.ne.s32.totalorder %s1735_s9, 0 }
  0x83   : > { %s1589_s15 = sand.u32 (!%p1743_p1), 1, %s1316_s22   ;;  %p1744_p12 = scmp.ne.s32.totalorder (!%p1743_p1), %s1732_s7, 0 }
  0x84   : > { %297 = sbr.rel (%p1743_p1) target bundleno = 813 (0x32d), region = 40  ;;  %s1592_s20 = sshll.u32 (!%p1743_p1), %s1589_s15, 3 }
  0x85   : > { %s300_s18 = scalar_lea.sflag (!%p1743_p1), [#allocation3], %s1589_s15  ;;  %s303_s21 = scalar_lea.vmem (!%p1743_p1), [#allocation2], %s1592_s20 }
  0x8b   : > { %1291 = dma.done.wait (%p1744_p12), %s300_s18, 128  }
  0x8c   : > { %1293 = vsyncadd (%p1744_p12), %s300_s18, 4294967168  ;;  %p1745_p7 = scmp.ne.s32.totalorder %s1730_s29, 0 }
  0x8e   : > { %1295 = dma.done.wait (%p1745_p7), [#allocation6], 3072  }
  0x8f   : > { %1297 = vsyncadd (%p1745_p7), [#allocation6], 4294964224 }
  0x90   : > { %1299 = dma.done.wait (%p1745_p7), [#allocation9], 2048  }
  0x91   : > { %1301 = vsyncadd (%p1745_p7), [#allocation9], 4294965248  ;;  %v1342_v0 = vmov 0.0   ;;  %v1343_v1 = vmov 0.0|0.0   ;;  %v357_v2 = vld [vmem:[#allocation5 + $0x8] sm:$0xff]  ;;  %v359_v3 = vld [vmem:[#allocation5 + $0x18] sm:$0xff] }
  0x92   : > { %432 = vmatprep.mubr.f32.mxu0 %v1342_v0  ;;  %943 = vmatprep.subr.bf16.mxu1 %v1343_v1  ;;  %v356_v4 = vld [vmem:[#allocation5] sm:$0xff]  ;;  %v935_v5 = vpack.c.bf16 %v359_v3, %v357_v2  ;;  %v358_v6 = vld [vmem:[#allocation5 + $0x10] sm:$0xff]  ;;  %v361_v7 = vld [vmem:[#allocation5 + $0x28] sm:$0xff]  ;;  %vm364_vm0 = vcmask 261120   ;;  %vm1344_vm1 = vmmov 0   ;;  %s351_s29 = scalar_lea.vmem [#allocation11], %s1592_s20 }
  0x93   : > { %v363_v8 = vld [vmem:[#allocation5 + $0x38] sm:$0xff]  ;;  %v937_v9 = vpack.c.bf16 %v358_v6, %v356_v4  ;;  %v360_v11 = vld [vmem:[#allocation5 + $0x20] sm:$0xff]  ;;  %v362_v12 = vld [vmem:[#allocation5 + $0x30] sm:$0xff]  ;;  %897 = vmatprep.mubr.msk.f32.mxu1 %vm1344_vm1, %v1342_v0  ;;  %p352_p13 = scmp.lt.s32.totalorder %s1324_s24, 1  ;;  %s656_s14 = sshll.u32 %s351_s29, 4  ;;  %s1636_s14 = int_to_ptr.vmem [resolvable:$true] %s656_s14 }
  0x94   : > { %v939_v10 = vpack.c.bf16 %v363_v8, %v361_v7  ;;  %936 = vmatprep.subr.bf16.mxu0 %v935_v5  ;;  %v439_v13 = vld [vmem:[#allocation7] sm:$0xff]  ;;  %v440_v14 = vld [vmem:[#allocation7 + $0x8] sm:$0xff]  ;;  %v441_v15 = vld [vmem:[#allocation7 + $0x10] sm:$0xff]  ;;  %v941_v16 = vpack.c.bf16 %v362_v12, %v360_v11  ;;  %s827_s13 = sshll.u32 %s1324_s24, 7  ;;  %s628_s27 = scalar_lea.sflag [#allocation12], %s1589_s15 }
  0x95   : > { %938 = vmatpush1.bf16.msra.mxu0 %v937_v9  ;;  %v944_v17 = vpack.c.bf16 %v440_v14, %v439_v13  ;;  %v442_v18 = vld [vmem:[#allocation7 + $0x18] sm:$0xff]  ;;  %v443_v20 = vld [vmem:[#allocation7 + $0x20] sm:$0xff]  ;;  %v444_v21 = vld [vmem:[#allocation7 + $0x28] sm:$0xff]  ;;  %s353_s7 = scalar_select %p352_p13, %s1324_s24, 1 }
  0x96   : > { %940 = vmatprep.subr.bf16.mxu0 %v939_v10  ;;  %v947_v19 = vpack.c.bf16 %v442_v18, %v441_v15  ;;  %v355_v22 = vld [vmem:[%s303_s21] sm:$0xff]  ;;  %v950_v23 = vpack.c.bf16 %v444_v21, %v443_v20  ;;  %v447_v27 = vld [vmem:[#allocation7 + $0x40] sm:$0xff]  ;;  %v448_v28 = vld [vmem:[#allocation7 + $0x48] sm:$0xff]  ;;  %s654_s8 = scalar_lea.hbm %s1721_s6, %s827_s13  ;;  %s1210_s28 = scalar_lea.vmem %s1636_s14, 128 }
  0x97   : > { %945 = vmatpush3.bf16.msra.mxu1 %v944_v17  ;;  %v445_v24 = vld [vmem:[#allocation7 + $0x30] sm:$0xff]  ;;  %v446_v25 = vld [vmem:[#allocation7 + $0x38] sm:$0xff]  ;;  %v956_v29 = vpack.c.bf16 %v448_v28, %v447_v27  ;;  %v451_v33 = vld [vmem:[#allocation7 + $0x60] sm:$0xff]  ;;  %s354_s11 = scalar_lea.vmem %s1718_s3, %s353_s7  ;;  %p1211_p6 = scmp.ne.s32.totalorder %s1636_s14, %s1210_s28 }
  0x98   : > { %946 = vmatprep.subr.bf16.mxu1 %v1343_v1  ;;  %v953_v26 = vpack.c.bf16 %v446_v25, %v445_v24  ;;  %v449_v30 = vld [vmem:[#allocation7 + $0x50] sm:$0xff]  ;;  %v450_v31 = vld [vmem:[#allocation7 + $0x58] sm:$0xff]  ;;  %v452_v34 = vld [vmem:[#allocation7 + $0x68] sm:$0xff]  ;;  %s1345_s30 = smov [#allocation11]  }
  0x99   : > { %942 = vmatpush1.bf16.msra.mxu0 %v941_v16  ;;  %v959_v32 = vpack.c.bf16 %v450_v31, %v449_v30  ;;  %v962_v35 = vpack.c.bf16 %v452_v34, %v451_v33  ;;  %v453_v36 = vld [vmem:[#allocation7 + $0x70] sm:$0xff]  ;;  %v454_v37 = vld [vmem:[#allocation7 + $0x78] sm:$0xff]  ;;  %v534_v39 = vld [vmem:[#allocation8] sm:$0xff]  ;;  %p1212_p10 = pnand %p1211_p6, %p1536_p3  ;;  %s1214_s18 = sshll.u32 %s1345_s30, 4  ;;  %s1215_s18 = int_to_ptr.vmem [resolvable:$false] %s1214_s18 }
  0x9a   : > { %967 = vmatprep.subr.bf16.mxu0 %v1343_v1  ;;  %v965_v38 = vpack.c.bf16 %v454_v37, %v453_v36  ;;  %v535_v40 = vld [vmem:[#allocation8 + $0x8] sm:$0xff]  ;;  %v536_v41 = vld [vmem:[#allocation8 + $0x10] sm:$0xff]  ;;  %v537_v43 = vld [vmem:[#allocation8 + $0x18] sm:$0xff]  ;;  %s1216_s21 = scalar_lea.vmem %s1215_s18, 256  ;;  %p1217_p5 = scmp.lt.s32.totalorder %s1636_s14, %s1215_s18 }
  0x9b   : > { %948 = vmatpush3.bf16.msra.mxu1 %v947_v19  ;;  %v968_v42 = vpack.c.bf16 %v535_v40, %v534_v39  ;;  %v971_v44 = vpack.c.bf16 %v537_v43, %v536_v41  ;;  %v538_v45 = vld [vmem:[#allocation8 + $0x20] sm:$0xff]  ;;  %v539_v46 = vld [vmem:[#allocation8 + $0x28] sm:$0xff]  ;;  %v540_v48 = vld [vmem:[#allocation8 + $0x30] sm:$0xff]  ;;  %p1213_p11 = pneg %p1212_p10  ;;  %p1218_p9 = scmp.lt.s32.totalorder %s1216_s21, %s1210_s28 }
  0x9c   : > { %823 = vmatmul.mubr.msk.f32.vlgmr.msra.gmra.mrb[0].mxu0 %vm364_vm0, %v355_v22  ;;  %949 = vmatprep.subr.bf16.mxu1 %v1343_v1  ;;  %v974_v47 = vpack.c.bf16 %v539_v46, %v538_v45  ;;  %v541_v49 = vld [vmem:[#allocation8 + $0x38] sm:$0xff]  ;;  %v542_v51 = vld [vmem:[#allocation8 + $0x40] sm:$0xff]  ;;  %v543_v52 = vld [vmem:[#allocation8 + $0x48] sm:$0xff] }
  0x9d   : > { %932 = vmatprep.mubr.msk.f32.mxu0 %vm1344_vm1, %v1342_v0  ;;  %969 = vmatpush3.bf16.msra.mxu0 %v968_v42  ;;  %v977_v50 = vpack.c.bf16 %v541_v49, %v540_v48  ;;  %v980_v53 = vpack.c.bf16 %v543_v52, %v542_v51  ;;  %v544_v54 = vld [vmem:[#allocation8 + $0x50] sm:$0xff]  ;;  %v545_v55 = vld [vmem:[#allocation8 + $0x58] sm:$0xff]  ;;  %v546_v59 = vld [vmem:[#allocation8 + $0x60] sm:$0xff]  ;;  %p1219_p0 = por %p1218_p9, %p1217_p5 }
  0x9e   : > { %970 = vmatprep.subr.bf16.mxu0 %v1343_v1  ;;  %v983_v56 = vpack.c.bf16 %v545_v55, %v544_v54  ;;  %v547_v60 = vld [vmem:[#allocation8 + $0x68] sm:$0xff]  ;;  %v548_v62 = vld [vmem:[#allocation8 + $0x70] sm:$0xff]  ;;  %v549_v63 = vld [vmem:[#allocation8 + $0x78] sm:$0xff] }
  0x9f   : > { %951 = vmatpush3.bf16.msra.mxu1 %v950_v23  ;;  %v986_v61 = vpack.c.bf16 %v547_v60, %v546_v59  ;;  %v989_v0 = vpack.c.bf16 %v549_v63, %v548_v62  ;;  %v824_v2 = vld [vmem:[%s354_s11] ss:$0 sm:$0xff]  ;;  %p1220_p4 = pnand %p1219_p0, %p1213_p11 }
  0xa0   : > { %952 = vmatprep.subr.bf16.mxu1 %v1343_v1 }
  0xa1   : > { %972 = vmatpush3.bf16.msra.mxu0 %v971_v44 }
  0xa2   : > { %973 = vmatprep.subr.bf16.mxu0 %v1343_v1 }
  0xa3   : > { %954 = vmatpush3.bf16.msra.mxu1 %v953_v26 }
  0xa4   : > { %955 = vmatprep.subr.bf16.mxu1 %v1343_v1 }
  0xa5   : > { %975 = vmatpush3.bf16.msra.mxu0 %v974_v47 }
  0xa6   : > { %976 = vmatprep.subr.bf16.mxu0 %v1343_v1 }
  0xa7   : > { %957 = vmatpush3.bf16.msra.mxu1 %v956_v29 }
  0xa8   : > { %958 = vmatprep.subr.bf16.mxu1 %v1343_v1 }
  0xa9   : > { %978 = vmatpush3.bf16.msra.mxu0 %v977_v50 }
  0xaa   : > { %979 = vmatprep.subr.bf16.mxu0 %v1343_v1 }
  0xab   : > { %960 = vmatpush3.bf16.msra.mxu1 %v959_v32 }
  0xac   : > { %961 = vmatprep.subr.bf16.mxu1 %v1343_v1 }
  0xad   : > { %981 = vmatpush3.bf16.msra.mxu0 %v980_v53 }
  0xae   : > { %982 = vmatprep.subr.bf16.mxu0 %v1343_v1 }
  0xaf   : > { %963 = vmatpush3.bf16.msra.mxu1 %v962_v35 }
  0xb0   : > { %964 = vmatprep.subr.bf16.mxu1 %v1343_v1 }
  0xb1   : > { %984 = vmatpush3.bf16.msra.mxu0 %v983_v56 }
  0xb2   : > { %985 = vmatprep.subr.bf16.mxu0 %v1343_v1 }
  0xb3   : > { %966 = vmatpush3.bf16.msra.mxu1 %v965_v38 }
  0xb5   : > { %987 = vmatpush3.bf16.msra.mxu0 %v986_v61 }
  0xb6   : > { %988 = vmatprep.subr.bf16.mxu0 %v1343_v1 }
  0xb9   : > { %990 = vmatpush3.bf16.msra.mxu0 %v989_v0 }
 0x16f   : > { %v434_v57 = vpop.f32.mrb[0].mxu0 }
 0x170   : > { %v436_v58 = vpop.f32.mrb[1].mxu0 }
 0x171   : > { %621 = vst [vmem:[%s351_s29] sm:$0xff] %v436_v58  ;;  %898 = vmatmul.mubr.f32.vlgmr.msra.gmra.mrb[0].mxu1 %v436_v58 }
 0x244   : > { %v528_v3 = vpop.f32.mrb[0].mxu1 }
 0x245   : > { %v529_v4 = vadd.f32 %v824_v2, %v528_v3  ;;  %v899_v5 = vpop.f32.mrb[1].mxu1 }
 0x247   : > { %v532_v6 = vmax.f32 %v529_v4, 0.0 }
 0x249   : > { %v533_v1 = vmul.f32 %v532_v6, %v434_v57 }
 0x24b   : > { %933 = vmatmul.mubr.f32.vlgmr.msra.gmra.mrb[2].mxu0 %v533_v1 }
 0x24c   : > { %1223 = shalt.err (!%p1220_p4)
}
 0x24d   : > { %s1224_s29 = scalar_lea.hbm %s654_s8, 128  ;;  %s1228_s10 = scalar_lea.hbm %s1721_s6, 256 }
 0x24e   : > { %p1225_p8 = scmp.ne.s32.totalorder %s654_s8, %s1224_s29  ;;  %p1229_p12 = scmp.lt.u32.totalorder %s654_s8, %s1721_s6 }
 0x24f   : > { %p1230_p7 = scmp.lt.u32.totalorder %s1228_s10, %s1224_s29  ;;  %p1232_p6 = scmp.lt.u32.totalorder %s1224_s29, %s654_s8 }
 0x250   : > { %p1226_p2 = pnand %p1225_p8, %p1536_p3 }
 0x251   : > { %p1231_p13 = por %p1230_p7, %p1229_p12 }
 0x252   : > { %p1227_p1 = pneg %p1226_p2 }
 0x253   : > { %p1233_p10 = por %p1232_p6, %p1231_p13 }
 0x255   : > { %p1234_p11 = pnand %p1233_p10, %p1227_p1 }
 0x257   : > { %1237 = shalt.err (!%p1234_p11)
}
 0x258   : > { %1006 = dma.vmem_to_hbm [thread:$0]  (%p1536_p3), %s1636_s14, 128, %s654_s8, %s628_s27  }
 0x259   : > { %s344_s19 = scalar_lea.vmem [#allocation10], %s1592_s20  ;;  %s1668_s21 = scalar_lea.hbm %s1720_s5, %s827_s13 }
 0x25a   : > { %s642_s28 = sshll.u32 %s344_s19, 4  ;;  %s623_s29 = scalar_lea.sflag [#allocation4], %s1589_s15  ;;  %s1661_s28 = int_to_ptr.vmem [resolvable:$true] %s642_s28 }
 0x25b   : > { %s1238_s7 = scalar_lea.vmem %s1661_s28, 128  ;;  %s1346_s20 = smov [#allocation10]  }
 0x25c   : > { %p1239_p5 = scmp.ne.s32.totalorder %s1661_s28, %s1238_s7  ;;  %s1242_s14 = sshll.u32 %s1346_s20, 4  ;;  %s1243_s14 = int_to_ptr.vmem [resolvable:$false] %s1242_s14 }
 0x25d   : > { %s1244_s24 = scalar_lea.vmem %s1243_s14, 256  ;;  %p1245_p4 = scmp.lt.s32.totalorder %s1661_s28, %s1243_s14 }
 0x25e   : > { %p1240_p9 = pnand %p1239_p5, %p1536_p3  ;;  %p1246_p8 = scmp.lt.s32.totalorder %s1244_s24, %s1238_s7 }
 0x260   : > { %p1241_p0 = pneg %p1240_p9  ;;  %p1247_p2 = por %p1246_p8, %p1245_p4 }
 0x262   : > { %p1248_p1 = pnand %p1247_p2, %p1241_p0 }
 0x31e   : > { %v616_v7 = vpop.f32.mrb[2].mxu0 }
 0x31f   : > { %620 = vst [vmem:[%s344_s19] sm:$0xff] %v616_v7  ;;  %v934_v8 = vpop.f32.mrb[3].mxu0 }
 0x320   : > { %1251 = shalt.err (!%p1248_p1)
}
 0x321   : > { %s1252_s15 = scalar_lea.hbm %s1668_s21, 128  ;;  %s1256_s27 = scalar_lea.hbm %s1720_s5, 256 }
 0x322   : > { %p1253_p12 = scmp.ne.s32.totalorder %s1668_s21, %s1252_s15  ;;  %p1257_p6 = scmp.lt.u32.totalorder %s1668_s21, %s1720_s5 }
 0x323   : > { %p1258_p10 = scmp.lt.u32.totalorder %s1256_s27, %s1252_s15  ;;  %p1260_p5 = scmp.lt.u32.totalorder %s1252_s15, %s1668_s21 }
 0x324   : > { %p1254_p7 = pnand %p1253_p12, %p1536_p3 }
 0x325   : > { %p1259_p11 = por %p1258_p10, %p1257_p6 }
 0x326   : > { %p1255_p13 = pneg %p1254_p7 }
 0x327   : > { %p1261_p9 = por %p1260_p5, %p1259_p11 }
 0x329   : > { %p1262_p0 = pnand %p1261_p9, %p1255_p13 }
 0x32b   : > { %1265 = shalt.err (!%p1262_p0)
}
 0x32c   : > { %1005 = dma.vmem_to_hbm [thread:$0]  (%p1536_p3), %s1661_s28, 128, %s1668_s21, %s623_s29  }
 0x32d PF: > { %s1746_s11 = sld [smem:[#allocation18_spill]]  ;;  %s1747_s12 = sld [smem:[#allocation19_spill]] }
 0x32e   : > { %p1749_p8 = scmp.ge.s32.totalorder %s1332_s26, 2 }
 0x333   : > { %s668_s19 = sand.u32 1, %s1746_s11   ;;  %p1748_p4 = scmp.ne.s32.totalorder %s1747_s12, 0 }
 0x334   : > { %s669_s30 = scalar_lea.sflag [#allocation4], %s668_s19 }
 0x335   : > { %p1024_p2 = pnand %p1749_p8, %p1748_p4 }
 0x337   : > { %1303 = dma.done.wait (!%p1024_p2), %s669_s30, 128  }
 0x338   : > { %1305 = vsyncadd (!%p1024_p2), %s669_s30, 4294967168  ;;  %s678_s18 = scalar_lea.sflag [#allocation12], %s668_s19 }
 0x339   : > { %1307 = dma.done.wait (!%p1024_p2), %s678_s18, 128  }
 0x33a   : > { %1309 = vsyncadd (!%p1024_p2), %s678_s18, 4294967168  ;;  %s28_s26 = sadd.s32 1, %s1332_s26   ;;  %s1750_s21 = smov %s1316_s22 }
 0x33b   : > { %p25_p1 = scmp.ge.s32.totalorder %s28_s26, 4   ;;  %s1751_s22 = smov %s1320_s23 }
 0x33c   : > { %s1752_s23 = smov %s1545_s17  ;;  %s1753_s24 = smov %s1328_s25 }
 0x33d   : > { %s1754_s25 = smov %s1756_s1  ;;  %27 = sbr.rel (!%p25_p1) target bundleno = 12 (0xc), region = 117 }
 0x344   :  { %683 = vsyncpa [#allocation3], 1 }
 0x345   :  { %685 = vsyncpa [#allocation3 + $0x1], 1 }
 0x346   :  { %686 = vsyncpa [#allocation6], 1 }
 0x347   :  { %687 = vsyncpa [#allocation9], 1 }
 0x348   :  { %688 = vsyncpa [#allocation4], 1 }
 0x349   :  { %690 = vsyncpa [#allocation4 + $0x1], 1 }
 0x34a   :  { %691 = vsyncpa [#allocation12], 1 }
 0x34b   :  { %693 = vsyncpa [#allocation12 + $0x1], 1 }

</bundles_post_ra>
